<compile_context>
chip_gen: v7x
topology: tpu7x:2x2x1
jax: 0.10.0
libtpu: 0.0.40
codegen_flags: <defaults>
</compile_context>

<pallas_src>
import math
import functools

import jax
import jax.numpy as jnp
from jax.experimental import pallas as pl
from jax.experimental.pallas import tpu as pltpu

# ----------------------------- small config ---------------------------------
HIDDEN = 32          # hidden_size
HEADS = 4            # num_heads
DEPTH = 2            # depth
MLP_RATIO = 4.0
FREQ_DIM = 256       # frequency_embedding_size
B = 2                # batch
NVIEW = 2            # views N
C_IN = 4             # in channels of the 2-D modality
IMG = 16             # width/height
PATCH = 8            # patch_size
GRID = IMG // PATCH                  # 2
P_PER_VIEW = GRID * GRID             # 4 patches per view
SEQ = NVIEW * P_PER_VIEW             # 8 tokens per batch element
MLP_HID = int(HIDDEN * MLP_RATIO)    # 128
HEAD_DIM = HIDDEN // HEADS           # 8
K_PATCH = C_IN * PATCH * PATCH       # 256


# ----------------------------- kernel helpers --------------------------------
def _layernorm(v, eps):
    mu = jnp.mean(v, axis=-1, keepdims=True)
    var = jnp.mean((v - mu) * (v - mu), axis=-1, keepdims=True)
    return (v - mu) * jax.lax.rsqrt(var + eps)


# ----------------------------- fused kernel ----------------------------------
def encoder_kernel(patches_ref, tfreq_ref,
                   pe_w_ref, pe_b_ref, ln_g_ref, ln_b_ref,
                   tw1_ref, tb1_ref, tw2_ref, tb2_ref,
                   ada_w_ref, ada_b_ref,
                   wqkv_ref, bqkv_ref, wo_ref, bo_ref,
                   w1_ref, b1_ref, w2_ref, b2_ref,
                   out_ref, *, num_heads, head_dim, depth, seq):
    S, H, hd = seq, num_heads, head_dim
    D = H * hd
    scale = 1.0 / math.sqrt(hd)
    bf = jnp.bfloat16

    # ---- condition_encoding: PatchEmbed (conv as matmul) + mod_norm LN ------
    tok = jnp.dot(patches_ref[...].astype(bf), pe_w_ref[...],
                  preferred_element_type=jnp.float32) + pe_b_ref[...]
    tok = _layernorm(tok, 1e-5) * ln_g_ref[...] + ln_b_ref[...]        # (S, D)

    # ---- TimestepEmbedder MLP for this batch element: (1, FREQ_DIM) --------
    tf = tfreq_ref[0].astype(bf)                                       # (1, 256)
    h0 = jnp.dot(tf, tw1_ref[...],
                 preferred_element_type=jnp.float32) + tb1_ref[...]
    h0 = h0 * jax.nn.sigmoid(h0)                                       # SiLU
    t_emb = jnp.dot(h0.astype(bf), tw2_ref[...],
                    preferred_element_type=jnp.float32) + tb2_ref[...]
    c_silu = (t_emb * jax.nn.sigmoid(t_emb)).astype(bf)                # (1, D)

    # ---- mv_encoder: DEPTH x DiTBlockSelfAttn, unrolled, tok stays resident -
    for d in range(depth):
        # adaLN-Zero modulation: ONE (1, D) x (D, 6D) matmul, static lane slices
        mod = jnp.dot(c_silu, ada_w_ref[d],
                      preferred_element_type=jnp.float32) + ada_b_ref[d]
        shift_msa = mod[:, 0 * D:1 * D]
        scale_msa = mod[:, 1 * D:2 * D]
        gate_msa = mod[:, 2 * D:3 * D]
        shift_mlp = mod[:, 3 * D:4 * D]
        scale_mlp = mod[:, 4 * D:5 * D]
        gate_mlp = mod[:, 5 * D:6 * D]

        # ---- self-attention branch (LayerNorm eps=1e-6, no affine) ----------
        xm = _layernorm(tok, 1e-6) * (1.0 + scale_msa) + shift_msa     # (S, D)
        qkv = jnp.dot(xm.astype(bf), wqkv_ref[d],
                      preferred_element_type=jnp.float32) + bqkv_ref[d]  # (S, 3D)
        ctx = []
        for h in range(H):                       # static lane slices per head
            q = qkv[:, h * hd:(h + 1) * hd].astype(bf)
            k = qkv[:, D + h * hd:D + (h + 1) * hd].astype(bf)
            v = qkv[:, 2 * D + h * hd:2 * D + (h + 1) * hd].astype(bf)
            s = jax.lax.dot_general(q, k, (((1,), (1,)), ((), ())),
                                    preferred_element_type=jnp.float32) * scale
            s = s - jnp.max(s, axis=-1, keepdims=True)                 # f32
            e = jnp.exp(s)
            p = e * pl.reciprocal(jnp.sum(e, axis=-1, keepdims=True),
                                  approx=True)
            ctx.append(jnp.dot(p.astype(bf), v,
                               preferred_element_type=jnp.float32))    # (S, hd)
        ctx = jnp.concatenate(ctx, axis=-1)                            # (S, D)
        attn = jnp.dot(ctx.astype(bf), wo_ref[d],
                       preferred_element_type=jnp.float32) + bo_ref[d]
        tok = tok + gate_msa * attn

        # ---- MLP branch (GELU approximate='tanh') ---------------------------
        xm2 = _layernorm(tok, 1e-6) * (1.0 + scale_mlp) + shift_mlp
        hmid = jnp.dot(xm2.astype(bf), w1_ref[d],
                       preferred_element_type=jnp.float32) + b1_ref[d]
        g = 0.5 * hmid * (1.0 + jnp.tanh(0.7978845608028654 *
                                         (hmid + 0.044715 * hmid * hmid * hmid)))
        mlp_out = jnp.dot(g.astype(bf), w2_ref[d],
                          preferred_element_type=jnp.float32) + b2_ref[d]
        tok = tok + gate_mlp * mlp_out

    out_ref[...] = tok.astype(out_ref.dtype)


# ----------------------------- host-side weight repacking --------------------
def prepare_fused_params(params):
    """Stack per-block weights along a depth axis; fuse q/k/v along lanes and
    keep wada / wo lane-dense (matmul weights in bfloat16, biases in f32)."""
    blocks = params['blocks']
    bf = jnp.bfloat16

    def stk(name, dtype):
        return jnp.stack([blk[name] for blk in blocks], axis=0).astype(dtype)

    wqkv = jnp.stack([jnp.concatenate([blk['wq'], blk['wk'], blk['wv']], axis=1)
                      for blk in blocks], axis=0).astype(bf)       # (depth, D, 3D)
    bqkv = jnp.stack([jnp.concatenate([blk['bq'], blk['bk'], blk['bv']], axis=1)
                      for blk in blocks], axis=0)                  # (depth, 1, 3D)
    return {
        'ada_w': stk('wada', bf),                # (depth, D, 6D)
        'ada_b': stk('bada', jnp.float32),       # (depth, 1, 6D)
        'wqkv': wqkv, 'bqkv': bqkv,
        'wo': stk('wo', bf), 'bo': stk('bo', jnp.float32),
        'w1': stk('w1', bf), 'b1': stk('b1', jnp.float32),
        'w2': stk('w2', bf), 'b2': stk('b2', jnp.float32),
    }


# ----------------------------- full Encoder forward --------------------------
def encoder_forward(t, cond_img, params):
    """cond_img: (B, N, C, H, W) float32 (NCHW per view), t: (B,)"""
    fused = prepare_fused_params(params)

    # --- patch extraction: stride=patch conv becomes a matmul over C*ps*ps ---
    BN = B * NVIEW
    x = cond_img.reshape(BN, C_IN, IMG, IMG)
    xp = x.reshape(BN, C_IN, GRID, PATCH, GRID, PATCH)
    xp = xp.transpose(0, 2, 4, 1, 3, 5)             # (BN, Hg, Wg, C, ps, ps)
    patches = xp.reshape(B * SEQ, K_PATCH)          # row r -> batch r // SEQ

    # --- sinusoidal timestep features (host side; tiny), one row per batch ---
    half = FREQ_DIM // 2
    freqs = jnp.exp(-math.log(10000.0) * jnp.arange(half, dtype=jnp.float32) / half)
    args = t[:, None].astype(jnp.float32) * freqs[None]
    t_freq = jnp.concatenate([jnp.cos(args), jnp.sin(args)], axis=-1)   # (B, 256)
    t_freq = t_freq.reshape(B, 1, FREQ_DIM)

    kernel = functools.partial(encoder_kernel, num_heads=HEADS, head_dim=HEAD_DIM,
                               depth=DEPTH, seq=SEQ)
    weight_operands = (
        params['pe_w'].astype(jnp.bfloat16), params['pe_b'],
        params['ln_g'], params['ln_b'],
        params['t_w1'].astype(jnp.bfloat16), params['t_b1'],
        params['t_w2'].astype(jnp.bfloat16), params['t_b2'],
        fused['ada_w'], fused['ada_b'],
        fused['wqkv'], fused['bqkv'], fused['wo'], fused['bo'],
        fused['w1'], fused['b1'], fused['w2'], fused['b2'],
    )
    in_specs = (
        [pl.BlockSpec((SEQ, K_PATCH), lambda b: (b, 0)),        # per-batch patches
         pl.BlockSpec((1, 1, FREQ_DIM), lambda b: (b, 0, 0))]   # per-batch t_freq
        + [pl.BlockSpec(memory_space=pltpu.MemorySpace.VMEM)    # weights resident
           for _ in weight_operands]
    )
    tok_flat = pl.pallas_call(
        kernel,
        out_shape=jax.ShapeDtypeStruct((B * SEQ, HIDDEN), jnp.float32),
        grid=(B,),
        in_specs=in_specs,
        out_specs=pl.BlockSpec((SEQ, HIDDEN), lambda b: (b, 0)),
        compiler_params=pltpu.CompilerParams(
            dimension_semantics=("parallel",),          # both TCs on v7x
            vmem_limit_bytes=16 * 1024 * 1024),
    )(patches, t_freq, *weight_operands)

    tok = tok_flat.reshape(B, SEQ, HIDDEN)          # full_to_padded (all valid)
    seqlen = jnp.full((B,), SEQ, dtype=jnp.int32)
    # (pe_cond_sinusoid, pe_cond_rope) are None here (pos_enc not defined upstream)
    return tok, seqlen


# ----------------------------- parameter init --------------------------------
def init_params(key):
    def nrm(k, shape, std=0.02):
        return jax.random.normal(k, shape, jnp.float32) * std

    keys = iter(jax.random.split(key, 64))
    params = {
        # PatchEmbed conv: torch weight (D, C, ps, ps) -> (K, D) for x @ W
        'pe_w': nrm(next(keys), (K_PATCH, HIDDEN)),
        'pe_b': jnp.zeros((1, HIDDEN), jnp.float32),
        # mod_norm LayerNorm affine
        'ln_g': jnp.ones((1, HIDDEN), jnp.float32),
        'ln_b': jnp.zeros((1, HIDDEN), jnp.float32),
        # TimestepEmbedder MLP
        't_w1': nrm(next(keys), (FREQ_DIM, HIDDEN)),
        't_b1': jnp.zeros((1, HIDDEN), jnp.float32),
        't_w2': nrm(next(keys), (HIDDEN, HIDDEN)),
        't_b2': jnp.zeros((1, HIDDEN), jnp.float32),
        'blocks': [],
    }
    for _ in range(DEPTH):
        blk = {
            # NOTE: adaLN weights are deterministic but non-zero (the reference
            # adaLN-Zero init zeros them, which would make the blocks identity
            # maps); kept non-zero so the full data path affects the output.
            'wada': nrm(next(keys), (HIDDEN, 6 * HIDDEN)),
            'bada': nrm(next(keys), (1, 6 * HIDDEN)),
            'wq': nrm(next(keys), (HIDDEN, HIDDEN)),
            'bq': jnp.zeros((1, HIDDEN), jnp.float32),
            'wk': nrm(next(keys), (HIDDEN, HIDDEN)),
            'bk': jnp.zeros((1, HIDDEN), jnp.float32),
            'wv': nrm(next(keys), (HIDDEN, HIDDEN)),
            'bv': jnp.zeros((1, HIDDEN), jnp.float32),
            'wo': nrm(next(keys), (HIDDEN, HIDDEN)),
            'bo': jnp.zeros((1, HIDDEN), jnp.float32),
            'w1': nrm(next(keys), (HIDDEN, MLP_HID)),
            'b1': jnp.zeros((1, MLP_HID), jnp.float32),
            'w2': nrm(next(keys), (MLP_HID, HIDDEN)),
            'b2': jnp.zeros((1, HIDDEN), jnp.float32),
        }
        params['blocks'].append(blk)
    return params


# ----------------------------- main -------------------------------------------
if __name__ == "__main__":
    key = jax.random.PRNGKey(0)
    k_par, k_img, k_t = jax.random.split(key, 3)

    params = init_params(k_par)
    cond_img = jax.random.normal(k_img, (B, NVIEW, C_IN, IMG, IMG), jnp.float32)
    t = jax.random.uniform(k_t, (B,), jnp.float32, 0.0, 1000.0)

    fwd = jax.jit(encoder_forward)
    tok, seqlen = fwd(t, cond_img, params)
    tok = jax.block_until_ready(tok)
    seqlen = jax.block_until_ready(seqlen)

    assert tok.shape == (B, SEQ, HIDDEN)
    assert seqlen.shape == (B,)
    assert bool(jnp.all(jnp.isfinite(tok)))
    print("KERNEL_OK")
</pallas_src>

<mosaic_0001>
module attributes {stable_mosaic.version = 11 : i64} {
  func.func @encoder_kernel(%arg0: i32, %arg1: memref<8x256xf32, #tpu.memory_space<vmem>>, %arg2: memref<1x1x256xf32, #tpu.memory_space<vmem>>, %arg3: memref<256x32xbf16, #tpu.memory_space<vmem>>, %arg4: memref<1x32xf32, #tpu.memory_space<vmem>>, %arg5: memref<1x32xf32, #tpu.memory_space<vmem>>, %arg6: memref<1x32xf32, #tpu.memory_space<vmem>>, %arg7: memref<256x32xbf16, #tpu.memory_space<vmem>>, %arg8: memref<1x32xf32, #tpu.memory_space<vmem>>, %arg9: memref<32x32xbf16, #tpu.memory_space<vmem>>, %arg10: memref<1x32xf32, #tpu.memory_space<vmem>>, %arg11: memref<2x32x192xbf16, #tpu.memory_space<vmem>>, %arg12: memref<2x1x192xf32, #tpu.memory_space<vmem>>, %arg13: memref<2x32x96xbf16, #tpu.memory_space<vmem>>, %arg14: memref<2x1x96xf32, #tpu.memory_space<vmem>>, %arg15: memref<2x32x32xbf16, #tpu.memory_space<vmem>>, %arg16: memref<2x1x32xf32, #tpu.memory_space<vmem>>, %arg17: memref<2x32x128xbf16, #tpu.memory_space<vmem>>, %arg18: memref<2x1x128xf32, #tpu.memory_space<vmem>>, %arg19: memref<2x128x32xbf16, #tpu.memory_space<vmem>>, %arg20: memref<2x1x32xf32, #tpu.memory_space<vmem>>, %arg21: memref<8x32xf32, #tpu.memory_space<vmem>>) attributes {dimension_semantics = [#tpu.dimension_semantics<parallel>], iteration_bounds = array<i64: 2>, scalar_prefetch = 0 : i64, scratch_operands = 0 : i64, tpu.core_type = #tpu.core_type<tc>, window_params = [{transform_indices = @transform_0, window_bounds = array<i64: 8, 256>}, {transform_indices = @transform_1, window_bounds = array<i64: 1, 1, 256>}, {pipeline_mode = #tpu.pipeline_mode<synchronous>, transform_indices = @transform_2, window_bounds = array<i64: 256, 32>}, {pipeline_mode = #tpu.pipeline_mode<synchronous>, transform_indices = @transform_3, window_bounds = array<i64: 1, 32>}, {pipeline_mode = #tpu.pipeline_mode<synchronous>, transform_indices = @transform_4, window_bounds = array<i64: 1, 32>}, {pipeline_mode = #tpu.pipeline_mode<synchronous>, transform_indices = @transform_5, window_bounds = array<i64: 1, 32>}, {pipeline_mode = #tpu.pipeline_mode<synchronous>, transform_indices = @transform_6, window_bounds = array<i64: 256, 32>}, {pipeline_mode = #tpu.pipeline_mode<synchronous>, transform_indices = @transform_7, window_bounds = array<i64: 1, 32>}, {pipeline_mode = #tpu.pipeline_mode<synchronous>, transform_indices = @transform_8, window_bounds = array<i64: 32, 32>}, {pipeline_mode = #tpu.pipeline_mode<synchronous>, transform_indices = @transform_9, window_bounds = array<i64: 1, 32>}, {pipeline_mode = #tpu.pipeline_mode<synchronous>, transform_indices = @transform_10, window_bounds = array<i64: 2, 32, 192>}, {pipeline_mode = #tpu.pipeline_mode<synchronous>, transform_indices = @transform_11, window_bounds = array<i64: 2, 1, 192>}, {pipeline_mode = #tpu.pipeline_mode<synchronous>, transform_indices = @transform_12, window_bounds = array<i64: 2, 32, 96>}, {pipeline_mode = #tpu.pipeline_mode<synchronous>, transform_indices = @transform_13, window_bounds = array<i64: 2, 1, 96>}, {pipeline_mode = #tpu.pipeline_mode<synchronous>, transform_indices = @transform_14, window_bounds = array<i64: 2, 32, 32>}, {pipeline_mode = #tpu.pipeline_mode<synchronous>, transform_indices = @transform_15, window_bounds = array<i64: 2, 1, 32>}, {pipeline_mode = #tpu.pipeline_mode<synchronous>, transform_indices = @transform_16, window_bounds = array<i64: 2, 32, 128>}, {pipeline_mode = #tpu.pipeline_mode<synchronous>, transform_indices = @transform_17, window_bounds = array<i64: 2, 1, 128>}, {pipeline_mode = #tpu.pipeline_mode<synchronous>, transform_indices = @transform_18, window_bounds = array<i64: 2, 128, 32>}, {pipeline_mode = #tpu.pipeline_mode<synchronous>, transform_indices = @transform_19, window_bounds = array<i64: 2, 1, 32>}, {transform_indices = @transform_20, window_bounds = array<i64: 8, 32>}]} {
    %c0 = arith.constant 0 : index
    %c0_0 = arith.constant 0 : index
    %0 = vector.load %arg1[%c0, %c0_0] : memref<8x256xf32, #tpu.memory_space<vmem>>, vector<8x256xf32>
    %1 = arith.truncf %0 : vector<8x256xf32> to vector<8x256xbf16>
    %c0_1 = arith.constant 0 : index
    %c0_2 = arith.constant 0 : index
    %2 = vector.load %arg3[%c0_1, %c0_2] : memref<256x32xbf16, #tpu.memory_space<vmem>>, vector<256x32xbf16>
    %cst = arith.constant dense<0.000000e+00> : vector<8x32xf32>
    %3 = tpu.matmul %1, %2, %cst {dimension_numbers = #tpu.dot_dimension_numbers<[1], [0], [0], [1], [0, 0, 1, 1], [], []>} : vector<8x256xbf16>, vector<256x32xbf16>, vector<8x32xf32> -> vector<8x32xf32>
    %c0_3 = arith.constant 0 : index
    %c0_4 = arith.constant 0 : index
    %4 = vector.load %arg4[%c0_3, %c0_4] : memref<1x32xf32, #tpu.memory_space<vmem>>, vector<1x32xf32>
    %5 = vector.broadcast %4 : vector<1x32xf32> to vector<8x32xf32>
    %6 = arith.addf %3, %5 : vector<8x32xf32>
    %cst_5 = arith.constant dense<0.000000e+00> : vector<8xf32>
    %7 = vector.multi_reduction <add>, %6, %cst_5 [1] : vector<8x32xf32> to vector<8xf32>
    %8 = vector.shape_cast %7 : vector<8xf32> to vector<8x1xf32>
    %cst_6 = arith.constant 3.200000e+01 : f32
    %9 = vector.broadcast %cst_6 : f32 to vector<8x1xf32>
    %10 = arith.divf %8, %9 : vector<8x1xf32>
    %11 = vector.broadcast %10 : vector<8x1xf32> to vector<8x32xf32>
    %12 = arith.subf %6, %11 : vector<8x32xf32>
    %13 = vector.broadcast %10 : vector<8x1xf32> to vector<8x32xf32>
    %14 = arith.subf %6, %13 : vector<8x32xf32>
    %15 = arith.mulf %12, %14 : vector<8x32xf32>
    %cst_7 = arith.constant dense<0.000000e+00> : vector<8xf32>
    %16 = vector.multi_reduction <add>, %15, %cst_7 [1] : vector<8x32xf32> to vector<8xf32>
    %17 = vector.shape_cast %16 : vector<8xf32> to vector<8x1xf32>
    %cst_8 = arith.constant 3.200000e+01 : f32
    %18 = vector.broadcast %cst_8 : f32 to vector<8x1xf32>
    %19 = arith.divf %17, %18 : vector<8x1xf32>
    %20 = vector.broadcast %10 : vector<8x1xf32> to vector<8x32xf32>
    %21 = arith.subf %6, %20 : vector<8x32xf32>
    %cst_9 = arith.constant 9.99999974E-6 : f32
    %22 = vector.broadcast %cst_9 : f32 to vector<8x1xf32>
    %23 = arith.addf %19, %22 : vector<8x1xf32>
    %24 = math.rsqrt %23 : vector<8x1xf32>
    %25 = vector.broadcast %24 : vector<8x1xf32> to vector<8x32xf32>
    %26 = arith.mulf %21, %25 : vector<8x32xf32>
    %c0_10 = arith.constant 0 : index
    %c0_11 = arith.constant 0 : index
    %27 = vector.load %arg5[%c0_10, %c0_11] : memref<1x32xf32, #tpu.memory_space<vmem>>, vector<1x32xf32>
    %28 = vector.broadcast %27 : vector<1x32xf32> to vector<8x32xf32>
    %29 = arith.mulf %26, %28 : vector<8x32xf32>
    %c0_12 = arith.constant 0 : index
    %c0_13 = arith.constant 0 : index
    %30 = vector.load %arg6[%c0_12, %c0_13] : memref<1x32xf32, #tpu.memory_space<vmem>>, vector<1x32xf32>
    %31 = vector.broadcast %30 : vector<1x32xf32> to vector<8x32xf32>
    %32 = arith.addf %29, %31 : vector<8x32xf32>
    %c0_14 = arith.constant 0 : index
    %c0_15 = arith.constant 0 : index
    %c0_16 = arith.constant 0 : index
    %33 = vector.load %arg2[%c0_14, %c0_15, %c0_16] : memref<1x1x256xf32, #tpu.memory_space<vmem>>, vector<1x1x256xf32>
    %34 = vector.shape_cast %33 : vector<1x1x256xf32> to vector<1x256xf32>
    %35 = arith.truncf %34 : vector<1x256xf32> to vector<1x256xbf16>
    %c0_17 = arith.constant 0 : index
    %c0_18 = arith.constant 0 : index
    %36 = vector.load %arg7[%c0_17, %c0_18] : memref<256x32xbf16, #tpu.memory_space<vmem>>, vector<256x32xbf16>
    %cst_19 = arith.constant dense<0.000000e+00> : vector<1x32xf32>
    %37 = tpu.matmul %35, %36, %cst_19 {dimension_numbers = #tpu.dot_dimension_numbers<[1], [0], [0], [1], [0, 0, 1, 1], [], []>} : vector<1x256xbf16>, vector<256x32xbf16>, vector<1x32xf32> -> vector<1x32xf32>
    %c0_20 = arith.constant 0 : index
    %c0_21 = arith.constant 0 : index
    %38 = vector.load %arg8[%c0_20, %c0_21] : memref<1x32xf32, #tpu.memory_space<vmem>>, vector<1x32xf32>
    %39 = arith.addf %37, %38 : vector<1x32xf32>
    %40 = arith.negf %39 : vector<1x32xf32>
    %41 = math.exp %40 : vector<1x32xf32>
    %cst_22 = arith.constant 1.000000e+00 : f32
    %42 = vector.broadcast %cst_22 : f32 to vector<1x32xf32>
    %43 = arith.addf %42, %41 : vector<1x32xf32>
    %44 = arith.divf %42, %43 : vector<1x32xf32>
    %45 = arith.mulf %39, %44 : vector<1x32xf32>
    %46 = arith.truncf %45 : vector<1x32xf32> to vector<1x32xbf16>
    %c0_23 = arith.constant 0 : index
    %c0_24 = arith.constant 0 : index
    %47 = vector.load %arg9[%c0_23, %c0_24] : memref<32x32xbf16, #tpu.memory_space<vmem>>, vector<32x32xbf16>
    %cst_25 = arith.constant dense<0.000000e+00> : vector<1x32xf32>
    %48 = tpu.matmul %46, %47, %cst_25 {dimension_numbers = #tpu.dot_dimension_numbers<[1], [0], [0], [1], [0, 0, 1, 1], [], []>} : vector<1x32xbf16>, vector<32x32xbf16>, vector<1x32xf32> -> vector<1x32xf32>
    %c0_26 = arith.constant 0 : index
    %c0_27 = arith.constant 0 : index
    %49 = vector.load %arg10[%c0_26, %c0_27] : memref<1x32xf32, #tpu.memory_space<vmem>>, vector<1x32xf32>
    %50 = arith.addf %48, %49 : vector<1x32xf32>
    %51 = arith.negf %50 : vector<1x32xf32>
    %52 = math.exp %51 : vector<1x32xf32>
    %cst_28 = arith.constant 1.000000e+00 : f32
    %53 = vector.broadcast %cst_28 : f32 to vector<1x32xf32>
    %54 = arith.addf %53, %52 : vector<1x32xf32>
    %55 = arith.divf %53, %54 : vector<1x32xf32>
    %56 = arith.mulf %50, %55 : vector<1x32xf32>
    %57 = arith.truncf %56 : vector<1x32xf32> to vector<1x32xbf16>
    %c0_29 = arith.constant 0 : index
    %c0_30 = arith.constant 0 : index
    %c0_31 = arith.constant 0 : index
    %58 = vector.load %arg11[%c0_29, %c0_30, %c0_31] : memref<2x32x192xbf16, #tpu.memory_space<vmem>>, vector<1x32x192xbf16>
    %59 = vector.shape_cast %58 : vector<1x32x192xbf16> to vector<32x192xbf16>
    %cst_32 = arith.constant dense<0.000000e+00> : vector<1x192xf32>
    %60 = tpu.matmul %57, %59, %cst_32 {dimension_numbers = #tpu.dot_dimension_numbers<[1], [0], [0], [1], [0, 0, 1, 1], [], []>} : vector<1x32xbf16>, vector<32x192xbf16>, vector<1x192xf32> -> vector<1x192xf32>
    %c0_33 = arith.constant 0 : index
    %c0_34 = arith.constant 0 : index
    %c0_35 = arith.constant 0 : index
    %61 = vector.load %arg12[%c0_33, %c0_34, %c0_35] : memref<2x1x192xf32, #tpu.memory_space<vmem>>, vector<1x1x192xf32>
    %62 = vector.shape_cast %61 : vector<1x1x192xf32> to vector<1x192xf32>
    %63 = arith.addf %60, %62 : vector<1x192xf32>
    %64 = vector.extract_strided_slice %63 {offsets = [0, 0], sizes = [1, 32], strides = [1, 1]} : vector<1x192xf32> to vector<1x32xf32>
    %65 = vector.extract_strided_slice %63 {offsets = [0, 32], sizes = [1, 32], strides = [1, 1]} : vector<1x192xf32> to vector<1x32xf32>
    %66 = vector.extract_strided_slice %63 {offsets = [0, 64], sizes = [1, 32], strides = [1, 1]} : vector<1x192xf32> to vector<1x32xf32>
    %67 = vector.extract_strided_slice %63 {offsets = [0, 96], sizes = [1, 32], strides = [1, 1]} : vector<1x192xf32> to vector<1x32xf32>
    %68 = vector.extract_strided_slice %63 {offsets = [0, 128], sizes = [1, 32], strides = [1, 1]} : vector<1x192xf32> to vector<1x32xf32>
    %69 = vector.extract_strided_slice %63 {offsets = [0, 160], sizes = [1, 32], strides = [1, 1]} : vector<1x192xf32> to vector<1x32xf32>
    %cst_36 = arith.constant dense<0.000000e+00> : vector<8xf32>
    %70 = vector.multi_reduction <add>, %32, %cst_36 [1] : vector<8x32xf32> to vector<8xf32>
    %71 = vector.shape_cast %70 : vector<8xf32> to vector<8x1xf32>
    %cst_37 = arith.constant 3.200000e+01 : f32
    %72 = vector.broadcast %cst_37 : f32 to vector<8x1xf32>
    %73 = arith.divf %71, %72 : vector<8x1xf32>
    %74 = vector.broadcast %73 : vector<8x1xf32> to vector<8x32xf32>
    %75 = arith.subf %32, %74 : vector<8x32xf32>
    %76 = vector.broadcast %73 : vector<8x1xf32> to vector<8x32xf32>
    %77 = arith.subf %32, %76 : vector<8x32xf32>
    %78 = arith.mulf %75, %77 : vector<8x32xf32>
    %cst_38 = arith.constant dense<0.000000e+00> : vector<8xf32>
    %79 = vector.multi_reduction <add>, %78, %cst_38 [1] : vector<8x32xf32> to vector<8xf32>
    %80 = vector.shape_cast %79 : vector<8xf32> to vector<8x1xf32>
    %cst_39 = arith.constant 3.200000e+01 : f32
    %81 = vector.broadcast %cst_39 : f32 to vector<8x1xf32>
    %82 = arith.divf %80, %81 : vector<8x1xf32>
    %83 = vector.broadcast %73 : vector<8x1xf32> to vector<8x32xf32>
    %84 = arith.subf %32, %83 : vector<8x32xf32>
    %cst_40 = arith.constant 9.99999997E-7 : f32
    %85 = vector.broadcast %cst_40 : f32 to vector<8x1xf32>
    %86 = arith.addf %82, %85 : vector<8x1xf32>
    %87 = math.rsqrt %86 : vector<8x1xf32>
    %88 = vector.broadcast %87 : vector<8x1xf32> to vector<8x32xf32>
    %89 = arith.mulf %84, %88 : vector<8x32xf32>
    %cst_41 = arith.constant 1.000000e+00 : f32
    %90 = vector.broadcast %cst_41 : f32 to vector<1x32xf32>
    %91 = arith.addf %90, %65 : vector<1x32xf32>
    %92 = vector.broadcast %91 : vector<1x32xf32> to vector<8x32xf32>
    %93 = arith.mulf %89, %92 : vector<8x32xf32>
    %94 = vector.broadcast %64 : vector<1x32xf32> to vector<8x32xf32>
    %95 = arith.addf %93, %94 : vector<8x32xf32>
    %96 = arith.truncf %95 : vector<8x32xf32> to vector<8x32xbf16>
    %c0_42 = arith.constant 0 : index
    %c0_43 = arith.constant 0 : index
    %c0_44 = arith.constant 0 : index
    %97 = vector.load %arg13[%c0_42, %c0_43, %c0_44] : memref<2x32x96xbf16, #tpu.memory_space<vmem>>, vector<1x32x96xbf16>
    %98 = vector.shape_cast %97 : vector<1x32x96xbf16> to vector<32x96xbf16>
    %cst_45 = arith.constant dense<0.000000e+00> : vector<8x96xf32>
    %99 = tpu.matmul %96, %98, %cst_45 {dimension_numbers = #tpu.dot_dimension_numbers<[1], [0], [0], [1], [0, 0, 1, 1], [], []>} : vector<8x32xbf16>, vector<32x96xbf16>, vector<8x96xf32> -> vector<8x96xf32>
    %c0_46 = arith.constant 0 : index
    %c0_47 = arith.constant 0 : index
    %c0_48 = arith.constant 0 : index
    %100 = vector.load %arg14[%c0_46, %c0_47, %c0_48] : memref<2x1x96xf32, #tpu.memory_space<vmem>>, vector<1x1x96xf32>
    %101 = vector.shape_cast %100 : vector<1x1x96xf32> to vector<1x96xf32>
    %102 = vector.broadcast %101 : vector<1x96xf32> to vector<8x96xf32>
    %103 = arith.addf %99, %102 : vector<8x96xf32>
    %104 = vector.extract_strided_slice %103 {offsets = [0, 0], sizes = [8, 8], strides = [1, 1]} : vector<8x96xf32> to vector<8x8xf32>
    %105 = arith.truncf %104 : vector<8x8xf32> to vector<8x8xbf16>
    %106 = vector.extract_strided_slice %103 {offsets = [0, 32], sizes = [8, 8], strides = [1, 1]} : vector<8x96xf32> to vector<8x8xf32>
    %107 = arith.truncf %106 : vector<8x8xf32> to vector<8x8xbf16>
    %108 = vector.extract_strided_slice %103 {offsets = [0, 64], sizes = [8, 8], strides = [1, 1]} : vector<8x96xf32> to vector<8x8xf32>
    %109 = arith.truncf %108 : vector<8x8xf32> to vector<8x8xbf16>
    %cst_49 = arith.constant dense<0.000000e+00> : vector<8x8xf32>
    %110 = tpu.matmul %105, %107, %cst_49 {dimension_numbers = #tpu.dot_dimension_numbers<[1], [1], [0], [0], [0, 0, 1, 0], [], []>} : vector<8x8xbf16>, vector<8x8xbf16>, vector<8x8xf32> -> vector<8x8xf32>
    %cst_50 = arith.constant 0.353553385 : f32
    %111 = vector.broadcast %cst_50 : f32 to vector<8x8xf32>
    %112 = arith.mulf %110, %111 : vector<8x8xf32>
    %cst_51 = arith.constant dense<0xFF800000> : vector<8xf32>
    %113 = vector.multi_reduction <maximumf>, %112, %cst_51 [1] : vector<8x8xf32> to vector<8xf32>
    %114 = vector.shape_cast %113 : vector<8xf32> to vector<8x1xf32>
    %115 = vector.broadcast %114 : vector<8x1xf32> to vector<8x8xf32>
    %116 = arith.subf %112, %115 : vector<8x8xf32>
    %117 = math.exp %116 : vector<8x8xf32>
    %cst_52 = arith.constant dense<0.000000e+00> : vector<8xf32>
    %118 = vector.multi_reduction <add>, %117, %cst_52 [1] : vector<8x8xf32> to vector<8xf32>
    %119 = vector.shape_cast %118 : vector<8xf32> to vector<8x1xf32>
    %120 = tpu.reciprocal %119 {approx = true} : vector<8x1xf32> -> vector<8x1xf32>
    %121 = vector.broadcast %120 : vector<8x1xf32> to vector<8x8xf32>
    %122 = arith.mulf %117, %121 : vector<8x8xf32>
    %123 = arith.truncf %122 : vector<8x8xf32> to vector<8x8xbf16>
    %cst_53 = arith.constant dense<0.000000e+00> : vector<8x8xf32>
    %124 = tpu.matmul %123, %109, %cst_53 {dimension_numbers = #tpu.dot_dimension_numbers<[1], [0], [0], [1], [0, 0, 1, 1], [], []>} : vector<8x8xbf16>, vector<8x8xbf16>, vector<8x8xf32> -> vector<8x8xf32>
    %125 = vector.extract_strided_slice %103 {offsets = [0, 8], sizes = [8, 8], strides = [1, 1]} : vector<8x96xf32> to vector<8x8xf32>
    %126 = arith.truncf %125 : vector<8x8xf32> to vector<8x8xbf16>
    %127 = vector.extract_strided_slice %103 {offsets = [0, 40], sizes = [8, 8], strides = [1, 1]} : vector<8x96xf32> to vector<8x8xf32>
    %128 = arith.truncf %127 : vector<8x8xf32> to vector<8x8xbf16>
    %129 = vector.extract_strided_slice %103 {offsets = [0, 72], sizes = [8, 8], strides = [1, 1]} : vector<8x96xf32> to vector<8x8xf32>
    %130 = arith.truncf %129 : vector<8x8xf32> to vector<8x8xbf16>
    %cst_54 = arith.constant dense<0.000000e+00> : vector<8x8xf32>
    %131 = tpu.matmul %126, %128, %cst_54 {dimension_numbers = #tpu.dot_dimension_numbers<[1], [1], [0], [0], [0, 0, 1, 0], [], []>} : vector<8x8xbf16>, vector<8x8xbf16>, vector<8x8xf32> -> vector<8x8xf32>
    %cst_55 = arith.constant 0.353553385 : f32
    %132 = vector.broadcast %cst_55 : f32 to vector<8x8xf32>
    %133 = arith.mulf %131, %132 : vector<8x8xf32>
    %cst_56 = arith.constant dense<0xFF800000> : vector<8xf32>
    %134 = vector.multi_reduction <maximumf>, %133, %cst_56 [1] : vector<8x8xf32> to vector<8xf32>
    %135 = vector.shape_cast %134 : vector<8xf32> to vector<8x1xf32>
    %136 = vector.broadcast %135 : vector<8x1xf32> to vector<8x8xf32>
    %137 = arith.subf %133, %136 : vector<8x8xf32>
    %138 = math.exp %137 : vector<8x8xf32>
    %cst_57 = arith.constant dense<0.000000e+00> : vector<8xf32>
    %139 = vector.multi_reduction <add>, %138, %cst_57 [1] : vector<8x8xf32> to vector<8xf32>
    %140 = vector.shape_cast %139 : vector<8xf32> to vector<8x1xf32>
    %141 = tpu.reciprocal %140 {approx = true} : vector<8x1xf32> -> vector<8x1xf32>
    %142 = vector.broadcast %141 : vector<8x1xf32> to vector<8x8xf32>
    %143 = arith.mulf %138, %142 : vector<8x8xf32>
    %144 = arith.truncf %143 : vector<8x8xf32> to vector<8x8xbf16>
    %cst_58 = arith.constant dense<0.000000e+00> : vector<8x8xf32>
    %145 = tpu.matmul %144, %130, %cst_58 {dimension_numbers = #tpu.dot_dimension_numbers<[1], [0], [0], [1], [0, 0, 1, 1], [], []>} : vector<8x8xbf16>, vector<8x8xbf16>, vector<8x8xf32> -> vector<8x8xf32>
    %146 = vector.extract_strided_slice %103 {offsets = [0, 16], sizes = [8, 8], strides = [1, 1]} : vector<8x96xf32> to vector<8x8xf32>
    %147 = arith.truncf %146 : vector<8x8xf32> to vector<8x8xbf16>
    %148 = vector.extract_strided_slice %103 {offsets = [0, 48], sizes = [8, 8], strides = [1, 1]} : vector<8x96xf32> to vector<8x8xf32>
    %149 = arith.truncf %148 : vector<8x8xf32> to vector<8x8xbf16>
    %150 = vector.extract_strided_slice %103 {offsets = [0, 80], sizes = [8, 8], strides = [1, 1]} : vector<8x96xf32> to vector<8x8xf32>
    %151 = arith.truncf %150 : vector<8x8xf32> to vector<8x8xbf16>
    %cst_59 = arith.constant dense<0.000000e+00> : vector<8x8xf32>
    %152 = tpu.matmul %147, %149, %cst_59 {dimension_numbers = #tpu.dot_dimension_numbers<[1], [1], [0], [0], [0, 0, 1, 0], [], []>} : vector<8x8xbf16>, vector<8x8xbf16>, vector<8x8xf32> -> vector<8x8xf32>
    %cst_60 = arith.constant 0.353553385 : f32
    %153 = vector.broadcast %cst_60 : f32 to vector<8x8xf32>
    %154 = arith.mulf %152, %153 : vector<8x8xf32>
    %cst_61 = arith.constant dense<0xFF800000> : vector<8xf32>
    %155 = vector.multi_reduction <maximumf>, %154, %cst_61 [1] : vector<8x8xf32> to vector<8xf32>
    %156 = vector.shape_cast %155 : vector<8xf32> to vector<8x1xf32>
    %157 = vector.broadcast %156 : vector<8x1xf32> to vector<8x8xf32>
    %158 = arith.subf %154, %157 : vector<8x8xf32>
    %159 = math.exp %158 : vector<8x8xf32>
    %cst_62 = arith.constant dense<0.000000e+00> : vector<8xf32>
    %160 = vector.multi_reduction <add>, %159, %cst_62 [1] : vector<8x8xf32> to vector<8xf32>
    %161 = vector.shape_cast %160 : vector<8xf32> to vector<8x1xf32>
    %162 = tpu.reciprocal %161 {approx = true} : vector<8x1xf32> -> vector<8x1xf32>
    %163 = vector.broadcast %162 : vector<8x1xf32> to vector<8x8xf32>
    %164 = arith.mulf %159, %163 : vector<8x8xf32>
    %165 = arith.truncf %164 : vector<8x8xf32> to vector<8x8xbf16>
    %cst_63 = arith.constant dense<0.000000e+00> : vector<8x8xf32>
    %166 = tpu.matmul %165, %151, %cst_63 {dimension_numbers = #tpu.dot_dimension_numbers<[1], [0], [0], [1], [0, 0, 1, 1], [], []>} : vector<8x8xbf16>, vector<8x8xbf16>, vector<8x8xf32> -> vector<8x8xf32>
    %167 = vector.extract_strided_slice %103 {offsets = [0, 24], sizes = [8, 8], strides = [1, 1]} : vector<8x96xf32> to vector<8x8xf32>
    %168 = arith.truncf %167 : vector<8x8xf32> to vector<8x8xbf16>
    %169 = vector.extract_strided_slice %103 {offsets = [0, 56], sizes = [8, 8], strides = [1, 1]} : vector<8x96xf32> to vector<8x8xf32>
    %170 = arith.truncf %169 : vector<8x8xf32> to vector<8x8xbf16>
    %171 = vector.extract_strided_slice %103 {offsets = [0, 88], sizes = [8, 8], strides = [1, 1]} : vector<8x96xf32> to vector<8x8xf32>
    %172 = arith.truncf %171 : vector<8x8xf32> to vector<8x8xbf16>
    %cst_64 = arith.constant dense<0.000000e+00> : vector<8x8xf32>
    %173 = tpu.matmul %168, %170, %cst_64 {dimension_numbers = #tpu.dot_dimension_numbers<[1], [1], [0], [0], [0, 0, 1, 0], [], []>} : vector<8x8xbf16>, vector<8x8xbf16>, vector<8x8xf32> -> vector<8x8xf32>
    %cst_65 = arith.constant 0.353553385 : f32
    %174 = vector.broadcast %cst_65 : f32 to vector<8x8xf32>
    %175 = arith.mulf %173, %174 : vector<8x8xf32>
    %cst_66 = arith.constant dense<0xFF800000> : vector<8xf32>
    %176 = vector.multi_reduction <maximumf>, %175, %cst_66 [1] : vector<8x8xf32> to vector<8xf32>
    %177 = vector.shape_cast %176 : vector<8xf32> to vector<8x1xf32>
    %178 = vector.broadcast %177 : vector<8x1xf32> to vector<8x8xf32>
    %179 = arith.subf %175, %178 : vector<8x8xf32>
    %180 = math.exp %179 : vector<8x8xf32>
    %cst_67 = arith.constant dense<0.000000e+00> : vector<8xf32>
    %181 = vector.multi_reduction <add>, %180, %cst_67 [1] : vector<8x8xf32> to vector<8xf32>
    %182 = vector.shape_cast %181 : vector<8xf32> to vector<8x1xf32>
    %183 = tpu.reciprocal %182 {approx = true} : vector<8x1xf32> -> vector<8x1xf32>
    %184 = vector.broadcast %183 : vector<8x1xf32> to vector<8x8xf32>
    %185 = arith.mulf %180, %184 : vector<8x8xf32>
    %186 = arith.truncf %185 : vector<8x8xf32> to vector<8x8xbf16>
    %cst_68 = arith.constant dense<0.000000e+00> : vector<8x8xf32>
    %187 = tpu.matmul %186, %172, %cst_68 {dimension_numbers = #tpu.dot_dimension_numbers<[1], [0], [0], [1], [0, 0, 1, 1], [], []>} : vector<8x8xbf16>, vector<8x8xbf16>, vector<8x8xf32> -> vector<8x8xf32>
    %188 = tpu.concatenate %124, %145, %166, %187 in 1 : vector<8x8xf32>, vector<8x8xf32>, vector<8x8xf32>, vector<8x8xf32> -> vector<8x32xf32>
    %189 = arith.truncf %188 : vector<8x32xf32> to vector<8x32xbf16>
    %c0_69 = arith.constant 0 : index
    %c0_70 = arith.constant 0 : index
    %c0_71 = arith.constant 0 : index
    %190 = vector.load %arg15[%c0_69, %c0_70, %c0_71] : memref<2x32x32xbf16, #tpu.memory_space<vmem>>, vector<1x32x32xbf16>
    %191 = vector.shape_cast %190 : vector<1x32x32xbf16> to vector<32x32xbf16>
    %cst_72 = arith.constant dense<0.000000e+00> : vector<8x32xf32>
    %192 = tpu.matmul %189, %191, %cst_72 {dimension_numbers = #tpu.dot_dimension_numbers<[1], [0], [0], [1], [0, 0, 1, 1], [], []>} : vector<8x32xbf16>, vector<32x32xbf16>, vector<8x32xf32> -> vector<8x32xf32>
    %c0_73 = arith.constant 0 : index
    %c0_74 = arith.constant 0 : index
    %c0_75 = arith.constant 0 : index
    %193 = vector.load %arg16[%c0_73, %c0_74, %c0_75] : memref<2x1x32xf32, #tpu.memory_space<vmem>>, vector<1x1x32xf32>
    %194 = vector.shape_cast %193 : vector<1x1x32xf32> to vector<1x32xf32>
    %195 = vector.broadcast %194 : vector<1x32xf32> to vector<8x32xf32>
    %196 = arith.addf %192, %195 : vector<8x32xf32>
    %197 = vector.broadcast %66 : vector<1x32xf32> to vector<8x32xf32>
    %198 = arith.mulf %197, %196 : vector<8x32xf32>
    %199 = arith.addf %32, %198 : vector<8x32xf32>
    %cst_76 = arith.constant dense<0.000000e+00> : vector<8xf32>
    %200 = vector.multi_reduction <add>, %199, %cst_76 [1] : vector<8x32xf32> to vector<8xf32>
    %201 = vector.shape_cast %200 : vector<8xf32> to vector<8x1xf32>
    %cst_77 = arith.constant 3.200000e+01 : f32
    %202 = vector.broadcast %cst_77 : f32 to vector<8x1xf32>
    %203 = arith.divf %201, %202 : vector<8x1xf32>
    %204 = vector.broadcast %203 : vector<8x1xf32> to vector<8x32xf32>
    %205 = arith.subf %199, %204 : vector<8x32xf32>
    %206 = vector.broadcast %203 : vector<8x1xf32> to vector<8x32xf32>
    %207 = arith.subf %199, %206 : vector<8x32xf32>
    %208 = arith.mulf %205, %207 : vector<8x32xf32>
    %cst_78 = arith.constant dense<0.000000e+00> : vector<8xf32>
    %209 = vector.multi_reduction <add>, %208, %cst_78 [1] : vector<8x32xf32> to vector<8xf32>
    %210 = vector.shape_cast %209 : vector<8xf32> to vector<8x1xf32>
    %cst_79 = arith.constant 3.200000e+01 : f32
    %211 = vector.broadcast %cst_79 : f32 to vector<8x1xf32>
    %212 = arith.divf %210, %211 : vector<8x1xf32>
    %213 = vector.broadcast %203 : vector<8x1xf32> to vector<8x32xf32>
    %214 = arith.subf %199, %213 : vector<8x32xf32>
    %cst_80 = arith.constant 9.99999997E-7 : f32
    %215 = vector.broadcast %cst_80 : f32 to vector<8x1xf32>
    %216 = arith.addf %212, %215 : vector<8x1xf32>
    %217 = math.rsqrt %216 : vector<8x1xf32>
    %218 = vector.broadcast %217 : vector<8x1xf32> to vector<8x32xf32>
    %219 = arith.mulf %214, %218 : vector<8x32xf32>
    %cst_81 = arith.constant 1.000000e+00 : f32
    %220 = vector.broadcast %cst_81 : f32 to vector<1x32xf32>
    %221 = arith.addf %220, %68 : vector<1x32xf32>
    %222 = vector.broadcast %221 : vector<1x32xf32> to vector<8x32xf32>
    %223 = arith.mulf %219, %222 : vector<8x32xf32>
    %224 = vector.broadcast %67 : vector<1x32xf32> to vector<8x32xf32>
    %225 = arith.addf %223, %224 : vector<8x32xf32>
    %226 = arith.truncf %225 : vector<8x32xf32> to vector<8x32xbf16>
    %c0_82 = arith.constant 0 : index
    %c0_83 = arith.constant 0 : index
    %c0_84 = arith.constant 0 : index
    %227 = vector.load %arg17[%c0_82, %c0_83, %c0_84] : memref<2x32x128xbf16, #tpu.memory_space<vmem>>, vector<1x32x128xbf16>
    %228 = vector.shape_cast %227 : vector<1x32x128xbf16> to vector<32x128xbf16>
    %cst_85 = arith.constant dense<0.000000e+00> : vector<8x128xf32>
    %229 = tpu.matmul %226, %228, %cst_85 {dimension_numbers = #tpu.dot_dimension_numbers<[1], [0], [0], [1], [0, 0, 1, 1], [], []>} : vector<8x32xbf16>, vector<32x128xbf16>, vector<8x128xf32> -> vector<8x128xf32>
    %c0_86 = arith.constant 0 : index
    %c0_87 = arith.constant 0 : index
    %c0_88 = arith.constant 0 : index
    %230 = vector.load %arg18[%c0_86, %c0_87, %c0_88] : memref<2x1x128xf32, #tpu.memory_space<vmem>>, vector<1x1x128xf32>
    %231 = vector.shape_cast %230 : vector<1x1x128xf32> to vector<1x128xf32>
    %232 = vector.broadcast %231 : vector<1x128xf32> to vector<8x128xf32>
    %233 = arith.addf %229, %232 : vector<8x128xf32>
    %cst_89 = arith.constant 5.000000e-01 : f32
    %234 = vector.broadcast %cst_89 : f32 to vector<8x128xf32>
    %235 = arith.mulf %234, %233 : vector<8x128xf32>
    %cst_90 = arith.constant 4.471500e-02 : f32
    %236 = vector.broadcast %cst_90 : f32 to vector<8x128xf32>
    %237 = arith.mulf %236, %233 : vector<8x128xf32>
    %238 = arith.mulf %237, %233 : vector<8x128xf32>
    %239 = arith.mulf %238, %233 : vector<8x128xf32>
    %240 = arith.addf %233, %239 : vector<8x128xf32>
    %cst_91 = arith.constant 0.797884583 : f32
    %241 = vector.broadcast %cst_91 : f32 to vector<8x128xf32>
    %242 = arith.mulf %241, %240 : vector<8x128xf32>
    %243 = math.tanh %242 : vector<8x128xf32>
    %cst_92 = arith.constant 1.000000e+00 : f32
    %244 = vector.broadcast %cst_92 : f32 to vector<8x128xf32>
    %245 = arith.addf %244, %243 : vector<8x128xf32>
    %246 = arith.mulf %235, %245 : vector<8x128xf32>
    %247 = arith.truncf %246 : vector<8x128xf32> to vector<8x128xbf16>
    %c0_93 = arith.constant 0 : index
    %c0_94 = arith.constant 0 : index
    %c0_95 = arith.constant 0 : index
    %248 = vector.load %arg19[%c0_93, %c0_94, %c0_95] : memref<2x128x32xbf16, #tpu.memory_space<vmem>>, vector<1x128x32xbf16>
    %249 = vector.shape_cast %248 : vector<1x128x32xbf16> to vector<128x32xbf16>
    %cst_96 = arith.constant dense<0.000000e+00> : vector<8x32xf32>
    %250 = tpu.matmul %247, %249, %cst_96 {dimension_numbers = #tpu.dot_dimension_numbers<[1], [0], [0], [1], [0, 0, 1, 1], [], []>} : vector<8x128xbf16>, vector<128x32xbf16>, vector<8x32xf32> -> vector<8x32xf32>
    %c0_97 = arith.constant 0 : index
    %c0_98 = arith.constant 0 : index
    %c0_99 = arith.constant 0 : index
    %251 = vector.load %arg20[%c0_97, %c0_98, %c0_99] : memref<2x1x32xf32, #tpu.memory_space<vmem>>, vector<1x1x32xf32>
    %252 = vector.shape_cast %251 : vector<1x1x32xf32> to vector<1x32xf32>
    %253 = vector.broadcast %252 : vector<1x32xf32> to vector<8x32xf32>
    %254 = arith.addf %250, %253 : vector<8x32xf32>
    %255 = vector.broadcast %69 : vector<1x32xf32> to vector<8x32xf32>
    %256 = arith.mulf %255, %254 : vector<8x32xf32>
    %257 = arith.addf %199, %256 : vector<8x32xf32>
    %c1 = arith.constant 1 : index
    %c0_100 = arith.constant 0 : index
    %c0_101 = arith.constant 0 : index
    %258 = vector.load %arg11[%c1, %c0_100, %c0_101] : memref<2x32x192xbf16, #tpu.memory_space<vmem>>, vector<1x32x192xbf16>
    %259 = vector.shape_cast %258 : vector<1x32x192xbf16> to vector<32x192xbf16>
    %cst_102 = arith.constant dense<0.000000e+00> : vector<1x192xf32>
    %260 = tpu.matmul %57, %259, %cst_102 {dimension_numbers = #tpu.dot_dimension_numbers<[1], [0], [0], [1], [0, 0, 1, 1], [], []>} : vector<1x32xbf16>, vector<32x192xbf16>, vector<1x192xf32> -> vector<1x192xf32>
    %c1_103 = arith.constant 1 : index
    %c0_104 = arith.constant 0 : index
    %c0_105 = arith.constant 0 : index
    %261 = vector.load %arg12[%c1_103, %c0_104, %c0_105] : memref<2x1x192xf32, #tpu.memory_space<vmem>>, vector<1x1x192xf32>
    %262 = vector.shape_cast %261 : vector<1x1x192xf32> to vector<1x192xf32>
    %263 = arith.addf %260, %262 : vector<1x192xf32>
    %264 = vector.extract_strided_slice %263 {offsets = [0, 0], sizes = [1, 32], strides = [1, 1]} : vector<1x192xf32> to vector<1x32xf32>
    %265 = vector.extract_strided_slice %263 {offsets = [0, 32], sizes = [1, 32], strides = [1, 1]} : vector<1x192xf32> to vector<1x32xf32>
    %266 = vector.extract_strided_slice %263 {offsets = [0, 64], sizes = [1, 32], strides = [1, 1]} : vector<1x192xf32> to vector<1x32xf32>
    %267 = vector.extract_strided_slice %263 {offsets = [0, 96], sizes = [1, 32], strides = [1, 1]} : vector<1x192xf32> to vector<1x32xf32>
    %268 = vector.extract_strided_slice %263 {offsets = [0, 128], sizes = [1, 32], strides = [1, 1]} : vector<1x192xf32> to vector<1x32xf32>
    %269 = vector.extract_strided_slice %263 {offsets = [0, 160], sizes = [1, 32], strides = [1, 1]} : vector<1x192xf32> to vector<1x32xf32>
    %cst_106 = arith.constant dense<0.000000e+00> : vector<8xf32>
    %270 = vector.multi_reduction <add>, %257, %cst_106 [1] : vector<8x32xf32> to vector<8xf32>
    %271 = vector.shape_cast %270 : vector<8xf32> to vector<8x1xf32>
    %cst_107 = arith.constant 3.200000e+01 : f32
    %272 = vector.broadcast %cst_107 : f32 to vector<8x1xf32>
    %273 = arith.divf %271, %272 : vector<8x1xf32>
    %274 = vector.broadcast %273 : vector<8x1xf32> to vector<8x32xf32>
    %275 = arith.subf %257, %274 : vector<8x32xf32>
    %276 = vector.broadcast %273 : vector<8x1xf32> to vector<8x32xf32>
    %277 = arith.subf %257, %276 : vector<8x32xf32>
    %278 = arith.mulf %275, %277 : vector<8x32xf32>
    %cst_108 = arith.constant dense<0.000000e+00> : vector<8xf32>
    %279 = vector.multi_reduction <add>, %278, %cst_108 [1] : vector<8x32xf32> to vector<8xf32>
    %280 = vector.shape_cast %279 : vector<8xf32> to vector<8x1xf32>
    %cst_109 = arith.constant 3.200000e+01 : f32
    %281 = vector.broadcast %cst_109 : f32 to vector<8x1xf32>
    %282 = arith.divf %280, %281 : vector<8x1xf32>
    %283 = vector.broadcast %273 : vector<8x1xf32> to vector<8x32xf32>
    %284 = arith.subf %257, %283 : vector<8x32xf32>
    %cst_110 = arith.constant 9.99999997E-7 : f32
    %285 = vector.broadcast %cst_110 : f32 to vector<8x1xf32>
    %286 = arith.addf %282, %285 : vector<8x1xf32>
    %287 = math.rsqrt %286 : vector<8x1xf32>
    %288 = vector.broadcast %287 : vector<8x1xf32> to vector<8x32xf32>
    %289 = arith.mulf %284, %288 : vector<8x32xf32>
    %cst_111 = arith.constant 1.000000e+00 : f32
    %290 = vector.broadcast %cst_111 : f32 to vector<1x32xf32>
    %291 = arith.addf %290, %265 : vector<1x32xf32>
    %292 = vector.broadcast %291 : vector<1x32xf32> to vector<8x32xf32>
    %293 = arith.mulf %289, %292 : vector<8x32xf32>
    %294 = vector.broadcast %264 : vector<1x32xf32> to vector<8x32xf32>
    %295 = arith.addf %293, %294 : vector<8x32xf32>
    %296 = arith.truncf %295 : vector<8x32xf32> to vector<8x32xbf16>
    %c1_112 = arith.constant 1 : index
    %c0_113 = arith.constant 0 : index
    %c0_114 = arith.constant 0 : index
    %297 = vector.load %arg13[%c1_112, %c0_113, %c0_114] : memref<2x32x96xbf16, #tpu.memory_space<vmem>>, vector<1x32x96xbf16>
    %298 = vector.shape_cast %297 : vector<1x32x96xbf16> to vector<32x96xbf16>
    %cst_115 = arith.constant dense<0.000000e+00> : vector<8x96xf32>
    %299 = tpu.matmul %296, %298, %cst_115 {dimension_numbers = #tpu.dot_dimension_numbers<[1], [0], [0], [1], [0, 0, 1, 1], [], []>} : vector<8x32xbf16>, vector<32x96xbf16>, vector<8x96xf32> -> vector<8x96xf32>
    %c1_116 = arith.constant 1 : index
    %c0_117 = arith.constant 0 : index
    %c0_118 = arith.constant 0 : index
    %300 = vector.load %arg14[%c1_116, %c0_117, %c0_118] : memref<2x1x96xf32, #tpu.memory_space<vmem>>, vector<1x1x96xf32>
    %301 = vector.shape_cast %300 : vector<1x1x96xf32> to vector<1x96xf32>
    %302 = vector.broadcast %301 : vector<1x96xf32> to vector<8x96xf32>
    %303 = arith.addf %299, %302 : vector<8x96xf32>
    %304 = vector.extract_strided_slice %303 {offsets = [0, 0], sizes = [8, 8], strides = [1, 1]} : vector<8x96xf32> to vector<8x8xf32>
    %305 = arith.truncf %304 : vector<8x8xf32> to vector<8x8xbf16>
    %306 = vector.extract_strided_slice %303 {offsets = [0, 32], sizes = [8, 8], strides = [1, 1]} : vector<8x96xf32> to vector<8x8xf32>
    %307 = arith.truncf %306 : vector<8x8xf32> to vector<8x8xbf16>
    %308 = vector.extract_strided_slice %303 {offsets = [0, 64], sizes = [8, 8], strides = [1, 1]} : vector<8x96xf32> to vector<8x8xf32>
    %309 = arith.truncf %308 : vector<8x8xf32> to vector<8x8xbf16>
    %cst_119 = arith.constant dense<0.000000e+00> : vector<8x8xf32>
    %310 = tpu.matmul %305, %307, %cst_119 {dimension_numbers = #tpu.dot_dimension_numbers<[1], [1], [0], [0], [0, 0, 1, 0], [], []>} : vector<8x8xbf16>, vector<8x8xbf16>, vector<8x8xf32> -> vector<8x8xf32>
    %cst_120 = arith.constant 0.353553385 : f32
    %311 = vector.broadcast %cst_120 : f32 to vector<8x8xf32>
    %312 = arith.mulf %310, %311 : vector<8x8xf32>
    %cst_121 = arith.constant dense<0xFF800000> : vector<8xf32>
    %313 = vector.multi_reduction <maximumf>, %312, %cst_121 [1] : vector<8x8xf32> to vector<8xf32>
    %314 = vector.shape_cast %313 : vector<8xf32> to vector<8x1xf32>
    %315 = vector.broadcast %314 : vector<8x1xf32> to vector<8x8xf32>
    %316 = arith.subf %312, %315 : vector<8x8xf32>
    %317 = math.exp %316 : vector<8x8xf32>
    %cst_122 = arith.constant dense<0.000000e+00> : vector<8xf32>
    %318 = vector.multi_reduction <add>, %317, %cst_122 [1] : vector<8x8xf32> to vector<8xf32>
    %319 = vector.shape_cast %318 : vector<8xf32> to vector<8x1xf32>
    %320 = tpu.reciprocal %319 {approx = true} : vector<8x1xf32> -> vector<8x1xf32>
    %321 = vector.broadcast %320 : vector<8x1xf32> to vector<8x8xf32>
    %322 = arith.mulf %317, %321 : vector<8x8xf32>
    %323 = arith.truncf %322 : vector<8x8xf32> to vector<8x8xbf16>
    %cst_123 = arith.constant dense<0.000000e+00> : vector<8x8xf32>
    %324 = tpu.matmul %323, %309, %cst_123 {dimension_numbers = #tpu.dot_dimension_numbers<[1], [0], [0], [1], [0, 0, 1, 1], [], []>} : vector<8x8xbf16>, vector<8x8xbf16>, vector<8x8xf32> -> vector<8x8xf32>
    %325 = vector.extract_strided_slice %303 {offsets = [0, 8], sizes = [8, 8], strides = [1, 1]} : vector<8x96xf32> to vector<8x8xf32>
    %326 = arith.truncf %325 : vector<8x8xf32> to vector<8x8xbf16>
    %327 = vector.extract_strided_slice %303 {offsets = [0, 40], sizes = [8, 8], strides = [1, 1]} : vector<8x96xf32> to vector<8x8xf32>
    %328 = arith.truncf %327 : vector<8x8xf32> to vector<8x8xbf16>
    %329 = vector.extract_strided_slice %303 {offsets = [0, 72], sizes = [8, 8], strides = [1, 1]} : vector<8x96xf32> to vector<8x8xf32>
    %330 = arith.truncf %329 : vector<8x8xf32> to vector<8x8xbf16>
    %cst_124 = arith.constant dense<0.000000e+00> : vector<8x8xf32>
    %331 = tpu.matmul %326, %328, %cst_124 {dimension_numbers = #tpu.dot_dimension_numbers<[1], [1], [0], [0], [0, 0, 1, 0], [], []>} : vector<8x8xbf16>, vector<8x8xbf16>, vector<8x8xf32> -> vector<8x8xf32>
    %cst_125 = arith.constant 0.353553385 : f32
    %332 = vector.broadcast %cst_125 : f32 to vector<8x8xf32>
    %333 = arith.mulf %331, %332 : vector<8x8xf32>
    %cst_126 = arith.constant dense<0xFF800000> : vector<8xf32>
    %334 = vector.multi_reduction <maximumf>, %333, %cst_126 [1] : vector<8x8xf32> to vector<8xf32>
    %335 = vector.shape_cast %334 : vector<8xf32> to vector<8x1xf32>
    %336 = vector.broadcast %335 : vector<8x1xf32> to vector<8x8xf32>
    %337 = arith.subf %333, %336 : vector<8x8xf32>
    %338 = math.exp %337 : vector<8x8xf32>
    %cst_127 = arith.constant dense<0.000000e+00> : vector<8xf32>
    %339 = vector.multi_reduction <add>, %338, %cst_127 [1] : vector<8x8xf32> to vector<8xf32>
    %340 = vector.shape_cast %339 : vector<8xf32> to vector<8x1xf32>
    %341 = tpu.reciprocal %340 {approx = true} : vector<8x1xf32> -> vector<8x1xf32>
    %342 = vector.broadcast %341 : vector<8x1xf32> to vector<8x8xf32>
    %343 = arith.mulf %338, %342 : vector<8x8xf32>
    %344 = arith.truncf %343 : vector<8x8xf32> to vector<8x8xbf16>
    %cst_128 = arith.constant dense<0.000000e+00> : vector<8x8xf32>
    %345 = tpu.matmul %344, %330, %cst_128 {dimension_numbers = #tpu.dot_dimension_numbers<[1], [0], [0], [1], [0, 0, 1, 1], [], []>} : vector<8x8xbf16>, vector<8x8xbf16>, vector<8x8xf32> -> vector<8x8xf32>
    %346 = vector.extract_strided_slice %303 {offsets = [0, 16], sizes = [8, 8], strides = [1, 1]} : vector<8x96xf32> to vector<8x8xf32>
    %347 = arith.truncf %346 : vector<8x8xf32> to vector<8x8xbf16>
    %348 = vector.extract_strided_slice %303 {offsets = [0, 48], sizes = [8, 8], strides = [1, 1]} : vector<8x96xf32> to vector<8x8xf32>
    %349 = arith.truncf %348 : vector<8x8xf32> to vector<8x8xbf16>
    %350 = vector.extract_strided_slice %303 {offsets = [0, 80], sizes = [8, 8], strides = [1, 1]} : vector<8x96xf32> to vector<8x8xf32>
    %351 = arith.truncf %350 : vector<8x8xf32> to vector<8x8xbf16>
    %cst_129 = arith.constant dense<0.000000e+00> : vector<8x8xf32>
    %352 = tpu.matmul %347, %349, %cst_129 {dimension_numbers = #tpu.dot_dimension_numbers<[1], [1], [0], [0], [0, 0, 1, 0], [], []>} : vector<8x8xbf16>, vector<8x8xbf16>, vector<8x8xf32> -> vector<8x8xf32>
    %cst_130 = arith.constant 0.353553385 : f32
    %353 = vector.broadcast %cst_130 : f32 to vector<8x8xf32>
    %354 = arith.mulf %352, %353 : vector<8x8xf32>
    %cst_131 = arith.constant dense<0xFF800000> : vector<8xf32>
    %355 = vector.multi_reduction <maximumf>, %354, %cst_131 [1] : vector<8x8xf32> to vector<8xf32>
    %356 = vector.shape_cast %355 : vector<8xf32> to vector<8x1xf32>
    %357 = vector.broadcast %356 : vector<8x1xf32> to vector<8x8xf32>
    %358 = arith.subf %354, %357 : vector<8x8xf32>
    %359 = math.exp %358 : vector<8x8xf32>
    %cst_132 = arith.constant dense<0.000000e+00> : vector<8xf32>
    %360 = vector.multi_reduction <add>, %359, %cst_132 [1] : vector<8x8xf32> to vector<8xf32>
    %361 = vector.shape_cast %360 : vector<8xf32> to vector<8x1xf32>
    %362 = tpu.reciprocal %361 {approx = true} : vector<8x1xf32> -> vector<8x1xf32>
    %363 = vector.broadcast %362 : vector<8x1xf32> to vector<8x8xf32>
    %364 = arith.mulf %359, %363 : vector<8x8xf32>
    %365 = arith.truncf %364 : vector<8x8xf32> to vector<8x8xbf16>
    %cst_133 = arith.constant dense<0.000000e+00> : vector<8x8xf32>
    %366 = tpu.matmul %365, %351, %cst_133 {dimension_numbers = #tpu.dot_dimension_numbers<[1], [0], [0], [1], [0, 0, 1, 1], [], []>} : vector<8x8xbf16>, vector<8x8xbf16>, vector<8x8xf32> -> vector<8x8xf32>
    %367 = vector.extract_strided_slice %303 {offsets = [0, 24], sizes = [8, 8], strides = [1, 1]} : vector<8x96xf32> to vector<8x8xf32>
    %368 = arith.truncf %367 : vector<8x8xf32> to vector<8x8xbf16>
    %369 = vector.extract_strided_slice %303 {offsets = [0, 56], sizes = [8, 8], strides = [1, 1]} : vector<8x96xf32> to vector<8x8xf32>
    %370 = arith.truncf %369 : vector<8x8xf32> to vector<8x8xbf16>
    %371 = vector.extract_strided_slice %303 {offsets = [0, 88], sizes = [8, 8], strides = [1, 1]} : vector<8x96xf32> to vector<8x8xf32>
    %372 = arith.truncf %371 : vector<8x8xf32> to vector<8x8xbf16>
    %cst_134 = arith.constant dense<0.000000e+00> : vector<8x8xf32>
    %373 = tpu.matmul %368, %370, %cst_134 {dimension_numbers = #tpu.dot_dimension_numbers<[1], [1], [0], [0], [0, 0, 1, 0], [], []>} : vector<8x8xbf16>, vector<8x8xbf16>, vector<8x8xf32> -> vector<8x8xf32>
    %cst_135 = arith.constant 0.353553385 : f32
    %374 = vector.broadcast %cst_135 : f32 to vector<8x8xf32>
    %375 = arith.mulf %373, %374 : vector<8x8xf32>
    %cst_136 = arith.constant dense<0xFF800000> : vector<8xf32>
    %376 = vector.multi_reduction <maximumf>, %375, %cst_136 [1] : vector<8x8xf32> to vector<8xf32>
    %377 = vector.shape_cast %376 : vector<8xf32> to vector<8x1xf32>
    %378 = vector.broadcast %377 : vector<8x1xf32> to vector<8x8xf32>
    %379 = arith.subf %375, %378 : vector<8x8xf32>
    %380 = math.exp %379 : vector<8x8xf32>
    %cst_137 = arith.constant dense<0.000000e+00> : vector<8xf32>
    %381 = vector.multi_reduction <add>, %380, %cst_137 [1] : vector<8x8xf32> to vector<8xf32>
    %382 = vector.shape_cast %381 : vector<8xf32> to vector<8x1xf32>
    %383 = tpu.reciprocal %382 {approx = true} : vector<8x1xf32> -> vector<8x1xf32>
    %384 = vector.broadcast %383 : vector<8x1xf32> to vector<8x8xf32>
    %385 = arith.mulf %380, %384 : vector<8x8xf32>
    %386 = arith.truncf %385 : vector<8x8xf32> to vector<8x8xbf16>
    %cst_138 = arith.constant dense<0.000000e+00> : vector<8x8xf32>
    %387 = tpu.matmul %386, %372, %cst_138 {dimension_numbers = #tpu.dot_dimension_numbers<[1], [0], [0], [1], [0, 0, 1, 1], [], []>} : vector<8x8xbf16>, vector<8x8xbf16>, vector<8x8xf32> -> vector<8x8xf32>
    %388 = tpu.concatenate %324, %345, %366, %387 in 1 : vector<8x8xf32>, vector<8x8xf32>, vector<8x8xf32>, vector<8x8xf32> -> vector<8x32xf32>
    %389 = arith.truncf %388 : vector<8x32xf32> to vector<8x32xbf16>
    %c1_139 = arith.constant 1 : index
    %c0_140 = arith.constant 0 : index
    %c0_141 = arith.constant 0 : index
    %390 = vector.load %arg15[%c1_139, %c0_140, %c0_141] : memref<2x32x32xbf16, #tpu.memory_space<vmem>>, vector<1x32x32xbf16>
    %391 = vector.shape_cast %390 : vector<1x32x32xbf16> to vector<32x32xbf16>
    %cst_142 = arith.constant dense<0.000000e+00> : vector<8x32xf32>
    %392 = tpu.matmul %389, %391, %cst_142 {dimension_numbers = #tpu.dot_dimension_numbers<[1], [0], [0], [1], [0, 0, 1, 1], [], []>} : vector<8x32xbf16>, vector<32x32xbf16>, vector<8x32xf32> -> vector<8x32xf32>
    %c1_143 = arith.constant 1 : index
    %c0_144 = arith.constant 0 : index
    %c0_145 = arith.constant 0 : index
    %393 = vector.load %arg16[%c1_143, %c0_144, %c0_145] : memref<2x1x32xf32, #tpu.memory_space<vmem>>, vector<1x1x32xf32>
    %394 = vector.shape_cast %393 : vector<1x1x32xf32> to vector<1x32xf32>
    %395 = vector.broadcast %394 : vector<1x32xf32> to vector<8x32xf32>
    %396 = arith.addf %392, %395 : vector<8x32xf32>
    %397 = vector.broadcast %266 : vector<1x32xf32> to vector<8x32xf32>
    %398 = arith.mulf %397, %396 : vector<8x32xf32>
    %399 = arith.addf %257, %398 : vector<8x32xf32>
    %cst_146 = arith.constant dense<0.000000e+00> : vector<8xf32>
    %400 = vector.multi_reduction <add>, %399, %cst_146 [1] : vector<8x32xf32> to vector<8xf32>
    %401 = vector.shape_cast %400 : vector<8xf32> to vector<8x1xf32>
    %cst_147 = arith.constant 3.200000e+01 : f32
    %402 = vector.broadcast %cst_147 : f32 to vector<8x1xf32>
    %403 = arith.divf %401, %402 : vector<8x1xf32>
    %404 = vector.broadcast %403 : vector<8x1xf32> to vector<8x32xf32>
    %405 = arith.subf %399, %404 : vector<8x32xf32>
    %406 = vector.broadcast %403 : vector<8x1xf32> to vector<8x32xf32>
    %407 = arith.subf %399, %406 : vector<8x32xf32>
    %408 = arith.mulf %405, %407 : vector<8x32xf32>
    %cst_148 = arith.constant dense<0.000000e+00> : vector<8xf32>
    %409 = vector.multi_reduction <add>, %408, %cst_148 [1] : vector<8x32xf32> to vector<8xf32>
    %410 = vector.shape_cast %409 : vector<8xf32> to vector<8x1xf32>
    %cst_149 = arith.constant 3.200000e+01 : f32
    %411 = vector.broadcast %cst_149 : f32 to vector<8x1xf32>
    %412 = arith.divf %410, %411 : vector<8x1xf32>
    %413 = vector.broadcast %403 : vector<8x1xf32> to vector<8x32xf32>
    %414 = arith.subf %399, %413 : vector<8x32xf32>
    %cst_150 = arith.constant 9.99999997E-7 : f32
    %415 = vector.broadcast %cst_150 : f32 to vector<8x1xf32>
    %416 = arith.addf %412, %415 : vector<8x1xf32>
    %417 = math.rsqrt %416 : vector<8x1xf32>
    %418 = vector.broadcast %417 : vector<8x1xf32> to vector<8x32xf32>
    %419 = arith.mulf %414, %418 : vector<8x32xf32>
    %cst_151 = arith.constant 1.000000e+00 : f32
    %420 = vector.broadcast %cst_151 : f32 to vector<1x32xf32>
    %421 = arith.addf %420, %268 : vector<1x32xf32>
    %422 = vector.broadcast %421 : vector<1x32xf32> to vector<8x32xf32>
    %423 = arith.mulf %419, %422 : vector<8x32xf32>
    %424 = vector.broadcast %267 : vector<1x32xf32> to vector<8x32xf32>
    %425 = arith.addf %423, %424 : vector<8x32xf32>
    %426 = arith.truncf %425 : vector<8x32xf32> to vector<8x32xbf16>
    %c1_152 = arith.constant 1 : index
    %c0_153 = arith.constant 0 : index
    %c0_154 = arith.constant 0 : index
    %427 = vector.load %arg17[%c1_152, %c0_153, %c0_154] : memref<2x32x128xbf16, #tpu.memory_space<vmem>>, vector<1x32x128xbf16>
    %428 = vector.shape_cast %427 : vector<1x32x128xbf16> to vector<32x128xbf16>
    %cst_155 = arith.constant dense<0.000000e+00> : vector<8x128xf32>
    %429 = tpu.matmul %426, %428, %cst_155 {dimension_numbers = #tpu.dot_dimension_numbers<[1], [0], [0], [1], [0, 0, 1, 1], [], []>} : vector<8x32xbf16>, vector<32x128xbf16>, vector<8x128xf32> -> vector<8x128xf32>
    %c1_156 = arith.constant 1 : index
    %c0_157 = arith.constant 0 : index
    %c0_158 = arith.constant 0 : index
    %430 = vector.load %arg18[%c1_156, %c0_157, %c0_158] : memref<2x1x128xf32, #tpu.memory_space<vmem>>, vector<1x1x128xf32>
    %431 = vector.shape_cast %430 : vector<1x1x128xf32> to vector<1x128xf32>
    %432 = vector.broadcast %431 : vector<1x128xf32> to vector<8x128xf32>
    %433 = arith.addf %429, %432 : vector<8x128xf32>
    %cst_159 = arith.constant 5.000000e-01 : f32
    %434 = vector.broadcast %cst_159 : f32 to vector<8x128xf32>
    %435 = arith.mulf %434, %433 : vector<8x128xf32>
    %cst_160 = arith.constant 4.471500e-02 : f32
    %436 = vector.broadcast %cst_160 : f32 to vector<8x128xf32>
    %437 = arith.mulf %436, %433 : vector<8x128xf32>
    %438 = arith.mulf %437, %433 : vector<8x128xf32>
    %439 = arith.mulf %438, %433 : vector<8x128xf32>
    %440 = arith.addf %433, %439 : vector<8x128xf32>
    %cst_161 = arith.constant 0.797884583 : f32
    %441 = vector.broadcast %cst_161 : f32 to vector<8x128xf32>
    %442 = arith.mulf %441, %440 : vector<8x128xf32>
    %443 = math.tanh %442 : vector<8x128xf32>
    %cst_162 = arith.constant 1.000000e+00 : f32
    %444 = vector.broadcast %cst_162 : f32 to vector<8x128xf32>
    %445 = arith.addf %444, %443 : vector<8x128xf32>
    %446 = arith.mulf %435, %445 : vector<8x128xf32>
    %447 = arith.truncf %446 : vector<8x128xf32> to vector<8x128xbf16>
    %c1_163 = arith.constant 1 : index
    %c0_164 = arith.constant 0 : index
    %c0_165 = arith.constant 0 : index
    %448 = vector.load %arg19[%c1_163, %c0_164, %c0_165] : memref<2x128x32xbf16, #tpu.memory_space<vmem>>, vector<1x128x32xbf16>
    %449 = vector.shape_cast %448 : vector<1x128x32xbf16> to vector<128x32xbf16>
    %cst_166 = arith.constant dense<0.000000e+00> : vector<8x32xf32>
    %450 = tpu.matmul %447, %449, %cst_166 {dimension_numbers = #tpu.dot_dimension_numbers<[1], [0], [0], [1], [0, 0, 1, 1], [], []>} : vector<8x128xbf16>, vector<128x32xbf16>, vector<8x32xf32> -> vector<8x32xf32>
    %c1_167 = arith.constant 1 : index
    %c0_168 = arith.constant 0 : index
    %c0_169 = arith.constant 0 : index
    %451 = vector.load %arg20[%c1_167, %c0_168, %c0_169] : memref<2x1x32xf32, #tpu.memory_space<vmem>>, vector<1x1x32xf32>
    %452 = vector.shape_cast %451 : vector<1x1x32xf32> to vector<1x32xf32>
    %453 = vector.broadcast %452 : vector<1x32xf32> to vector<8x32xf32>
    %454 = arith.addf %450, %453 : vector<8x32xf32>
    %455 = vector.broadcast %269 : vector<1x32xf32> to vector<8x32xf32>
    %456 = arith.mulf %455, %454 : vector<8x32xf32>
    %457 = arith.addf %399, %456 : vector<8x32xf32>
    %c0_170 = arith.constant 0 : index
    %c0_171 = arith.constant 0 : index
    %458 = vector.load %arg21[%c0_170, %c0_171] : memref<8x32xf32, #tpu.memory_space<vmem>>, vector<8x32xf32>
    tpu.vector_store %arg21[%c0_170, %c0_171], %457 {strides = array<i32>} : memref<8x32xf32, #tpu.memory_space<vmem>>, vector<8x32xf32>,
    return
  }
  func.func @transform_0(%arg0: i32) -> (i32, i32) {
    %c0_i32 = arith.constant 0 : i32
    %c0_i32_0 = arith.constant 0 : i32
    return %arg0, %c0_i32 : i32, i32
  }
  func.func @transform_1(%arg0: i32) -> (i32, i32, i32) {
    %c0_i32 = arith.constant 0 : i32
    %c0_i32_0 = arith.constant 0 : i32
    %c0_i32_1 = arith.constant 0 : i32
    return %arg0, %c0_i32, %c0_i32_0 : i32, i32, i32
  }
  func.func @transform_2(%arg0: i32) -> (i32, i32) {
    %c0_i32 = arith.constant 0 : i32
    %c0_i32_0 = arith.constant 0 : i32
    %c0_i32_1 = arith.constant 0 : i32
    return %c0_i32, %c0_i32_0 : i32, i32
  }
  func.func @transform_3(%arg0: i32) -> (i32, i32) {
    %c0_i32 = arith.constant 0 : i32
    %c0_i32_0 = arith.constant 0 : i32
    %c0_i32_1 = arith.constant 0 : i32
    return %c0_i32, %c0_i32_0 : i32, i32
  }
  func.func @transform_4(%arg0: i32) -> (i32, i32) {
    %c0_i32 = arith.constant 0 : i32
    %c0_i32_0 = arith.constant 0 : i32
    %c0_i32_1 = arith.constant 0 : i32
    return %c0_i32, %c0_i32_0 : i32, i32
  }
  func.func @transform_5(%arg0: i32) -> (i32, i32) {
    %c0_i32 = arith.constant 0 : i32
    %c0_i32_0 = arith.constant 0 : i32
    %c0_i32_1 = arith.constant 0 : i32
    return %c0_i32, %c0_i32_0 : i32, i32
  }
  func.func @transform_6(%arg0: i32) -> (i32, i32) {
    %c0_i32 = arith.constant 0 : i32
    %c0_i32_0 = arith.constant 0 : i32
    %c0_i32_1 = arith.constant 0 : i32
    return %c0_i32, %c0_i32_0 : i32, i32
  }
  func.func @transform_7(%arg0: i32) -> (i32, i32) {
    %c0_i32 = arith.constant 0 : i32
    %c0_i32_0 = arith.constant 0 : i32
    %c0_i32_1 = arith.constant 0 : i32
    return %c0_i32, %c0_i32_0 : i32, i32
  }
  func.func @transform_8(%arg0: i32) -> (i32, i32) {
    %c0_i32 = arith.constant 0 : i32
    %c0_i32_0 = arith.constant 0 : i32
    %c0_i32_1 = arith.constant 0 : i32
    return %c0_i32, %c0_i32_0 : i32, i32
  }
  func.func @transform_9(%arg0: i32) -> (i32, i32) {
    %c0_i32 = arith.constant 0 : i32
    %c0_i32_0 = arith.constant 0 : i32
    %c0_i32_1 = arith.constant 0 : i32
    return %c0_i32, %c0_i32_0 : i32, i32
  }
  func.func @transform_10(%arg0: i32) -> (i32, i32, i32) {
    %c0_i32 = arith.constant 0 : i32
    %c0_i32_0 = arith.constant 0 : i32
    %c0_i32_1 = arith.constant 0 : i32
    %c0_i32_2 = arith.constant 0 : i32
    return %c0_i32, %c0_i32_0, %c0_i32_1 : i32, i32, i32
  }
  func.func @transform_11(%arg0: i32) -> (i32, i32, i32) {
    %c0_i32 = arith.constant 0 : i32
    %c0_i32_0 = arith.constant 0 : i32
    %c0_i32_1 = arith.constant 0 : i32
    %c0_i32_2 = arith.constant 0 : i32
    return %c0_i32, %c0_i32_0, %c0_i32_1 : i32, i32, i32
  }
  func.func @transform_12(%arg0: i32) -> (i32, i32, i32) {
    %c0_i32 = arith.constant 0 : i32
    %c0_i32_0 = arith.constant 0 : i32
    %c0_i32_1 = arith.constant 0 : i32
    %c0_i32_2 = arith.constant 0 : i32
    return %c0_i32, %c0_i32_0, %c0_i32_1 : i32, i32, i32
  }
  func.func @transform_13(%arg0: i32) -> (i32, i32, i32) {
    %c0_i32 = arith.constant 0 : i32
    %c0_i32_0 = arith.constant 0 : i32
    %c0_i32_1 = arith.constant 0 : i32
    %c0_i32_2 = arith.constant 0 : i32
    return %c0_i32, %c0_i32_0, %c0_i32_1 : i32, i32, i32
  }
  func.func @transform_14(%arg0: i32) -> (i32, i32, i32) {
    %c0_i32 = arith.constant 0 : i32
    %c0_i32_0 = arith.constant 0 : i32
    %c0_i32_1 = arith.constant 0 : i32
    %c0_i32_2 = arith.constant 0 : i32
    return %c0_i32, %c0_i32_0, %c0_i32_1 : i32, i32, i32
  }
  func.func @transform_15(%arg0: i32) -> (i32, i32, i32) {
    %c0_i32 = arith.constant 0 : i32
    %c0_i32_0 = arith.constant 0 : i32
    %c0_i32_1 = arith.constant 0 : i32
    %c0_i32_2 = arith.constant 0 : i32
    return %c0_i32, %c0_i32_0, %c0_i32_1 : i32, i32, i32
  }
  func.func @transform_16(%arg0: i32) -> (i32, i32, i32) {
    %c0_i32 = arith.constant 0 : i32
    %c0_i32_0 = arith.constant 0 : i32
    %c0_i32_1 = arith.constant 0 : i32
    %c0_i32_2 = arith.constant 0 : i32
    return %c0_i32, %c0_i32_0, %c0_i32_1 : i32, i32, i32
  }
  func.func @transform_17(%arg0: i32) -> (i32, i32, i32) {
    %c0_i32 = arith.constant 0 : i32
    %c0_i32_0 = arith.constant 0 : i32
    %c0_i32_1 = arith.constant 0 : i32
    %c0_i32_2 = arith.constant 0 : i32
    return %c0_i32, %c0_i32_0, %c0_i32_1 : i32, i32, i32
  }
  func.func @transform_18(%arg0: i32) -> (i32, i32, i32) {
    %c0_i32 = arith.constant 0 : i32
    %c0_i32_0 = arith.constant 0 : i32
    %c0_i32_1 = arith.constant 0 : i32
    %c0_i32_2 = arith.constant 0 : i32
    return %c0_i32, %c0_i32_0, %c0_i32_1 : i32, i32, i32
  }
  func.func @transform_19(%arg0: i32) -> (i32, i32, i32) {
    %c0_i32 = arith.constant 0 : i32
    %c0_i32_0 = arith.constant 0 : i32
    %c0_i32_1 = arith.constant 0 : i32
    %c0_i32_2 = arith.constant 0 : i32
    return %c0_i32, %c0_i32_0, %c0_i32_1 : i32, i32, i32
  }
  func.func @transform_20(%arg0: i32) -> (i32, i32) {
    %c0_i32 = arith.constant 0 : i32
    %c0_i32_0 = arith.constant 0 : i32
    return %arg0, %c0_i32 : i32, i32
  }
}

</mosaic_0001>

<bundles_post_ra>
// kernel: encoder_forward.1
= control target key start
LH: loop header
LB: loop body
LE: loop exit
PB: predicated region body
PF: predicated region fallthrough
CT: control target
= control target key end

     0   :  { %s4582_s0 = inlined_call_operand.vmem [shape: f32[16,256], index: 0, kind: input, shape index: {}]   ;;  %s4583_s1 = inlined_call_operand.vmem [shape: f32[2,1,256], index: 1, kind: input, shape index: {}]   ;;  %s4584_s2 = inlined_call_operand.vmem [shape: bf16[256,32], index: 2, kind: input, shape index: {}]   ;;  %s4585_s3 = inlined_call_operand.vmem [shape: f32[1,32], index: 3, kind: input, shape index: {}]   ;;  %s4586_s4 = inlined_call_operand.vmem [shape: f32[1,32], index: 4, kind: input, shape index: {}]   ;;  %s4587_s5 = inlined_call_operand.vmem [shape: f32[1,32], index: 5, kind: input, shape index: {}]   ;;  %s4588_s6 = inlined_call_operand.vmem [shape: bf16[256,32], index: 6, kind: input, shape index: {}]   ;;  %s4589_s7 = inlined_call_operand.vmem [shape: f32[1,32], index: 7, kind: input, shape index: {}]   ;;  %s4590_s8 = inlined_call_operand.vmem [shape: bf16[32,32], index: 8, kind: input, shape index: {}]   ;;  %s4591_s9 = inlined_call_operand.vmem [shape: f32[1,32], index: 9, kind: input, shape index: {}]   ;;  %s4592_s10 = inlined_call_operand.vmem [shape: bf16[2,32,192], index: 10, kind: input, shape index: {}]   ;;  %s4593_s11 = inlined_call_operand.vmem [shape: f32[2,1,192], index: 11, kind: input, shape index: {}]   ;;  %s4594_s12 = inlined_call_operand.vmem [shape: bf16[2,32,96], index: 12, kind: input, shape index: {}]   ;;  %s4595_s13 = inlined_call_operand.vmem [shape: f32[2,1,96], index: 13, kind: input, shape index: {}]   ;;  %s4596_s14 = inlined_call_operand.vmem [shape: bf16[2,32,32], index: 14, kind: input, shape index: {}]   ;;  %s4597_s15 = inlined_call_operand.vmem [shape: f32[2,1,32], index: 15, kind: input, shape index: {}]   ;;  %s4598_s16 = inlined_call_operand.vmem [shape: bf16[2,32,128], index: 16, kind: input, shape index: {}]   ;;  %s4599_s17 = inlined_call_operand.vmem [shape: f32[2,1,128], index: 17, kind: input, shape index: {}]   ;;  %s4600_s18 = inlined_call_operand.vmem [shape: bf16[2,128,32], index: 18, kind: input, shape index: {}]   ;;  %s4601_s19 = inlined_call_operand.vmem [shape: f32[2,1,32], index: 19, kind: input, shape index: {}]   ;;  %s4602_s20 = inlined_call_operand.hbm [shape: f32[16,32], index: 20, kind: output, shape index: {}]  }
   0x1   :  { %4624 = sst [smem:[#allocation14_spill]] %s4582_s0 }
   0x2   :  { %4625 = sst [smem:[#allocation15_spill]] %s4583_s1 }
   0x3   :  { %4626 = sst [smem:[#allocation16_spill]] %s4584_s2 }
   0x4   :  { %4627 = sst [smem:[#allocation17_spill]] %s4585_s3 }
   0x5   :  { %4628 = sst [smem:[#allocation18_spill]] %s4586_s4 }
   0x6   :  { %4629 = sst [smem:[#allocation19_spill]] %s4601_s19 }
   0x7   :  { %4630 = sst [smem:[#allocation20_spill]] %s4602_s20 }
   0x8   :  { %25 = vsyncpa [#allocation3], 0 }
   0x9   :  { %27 = vsyncpa [#allocation3 + $0x1], 0  ;;  %s3924_s1 = smov 0   ;;  %s3926_s22 = smov 0  }
   0xa   :  { %s3928_s23 = smov 0   ;;  %s3930_s24 = smov 0  }
   0xb LB: > { %4631 = sst [smem:[#allocation5_spill]] %s3786_s1  ;;  %s3945_s2 = sadd.s32 4294967295, %s3798_s24   ;;  %s3798_s24 = sphi %s3930_s24, %s4663_s24   ;;  %s3794_s23 = sphi %s3928_s23, %s4666_s23   ;;  %s3790_s22 = sphi %s3926_s22, %s4665_s22   ;;  %s3786_s1 = sphi %s3924_s1, %s4664_s1  }
   0xc   : > { %4632 = sst [smem:[#allocation6_spill]] %s3790_s22  ;;  %s3086_s25 = sadd.s32 4294967294, %s3798_s24  }
   0xd   : > { %4633 = sst [smem:[#allocation7_spill]] %s3794_s23  ;;  %s3949_s3 = sadd.s32 1, %s3798_s24  }
   0xe   : > { %4634 = sst [smem:[#allocation8_spill]] %s3798_s24  ;;  %s470_s26 = sadd.s32 1, %s3794_s23 }
   0xf   : > { %4635 = sst [smem:[#allocation9_spill]] %s3945_s2  ;;  %s467_s27 = ssub.s32 %s3798_s24, %s3949_s3 }
  0x10   : > { %4636 = sst [smem:[#allocation10_spill]] %s3949_s3  ;;  %p480_p0 = scmp.ne.s32.totalorder %s3794_s23, %s3790_s22 }
  0x11   : > { %p468_p1 = scmp.eq.s32.totalorder %s467_s27, 0  ;;  %p481_p2 = scmp.eq.s32.totalorder %s3945_s2, 1 }
  0x12   : > { %p486_p3 = scmp.ne.s32.totalorder %s3790_s22, %s3786_s1  ;;  %p487_p4 = scmp.eq.s32.totalorder %s3086_s25, 1 }
  0x13   : > { %s3960_s28 = scalar_select %p468_p1, %s3794_s23, %s470_s26  }
  0x14   : > { %p3962_p5 = por %p481_p2, %p480_p0  ;;  %p3966_p6 = por %p487_p4, %p486_p3 }
  0x15   : > { %4637 = sst [smem:[#allocation11_spill]] %s3960_s28  ;;  %p3089_p7 = scmp.ge.s32.totalorder %s3798_s24, 1 }
  0x16   : > { %s4638_s4 = scalar_select %p3962_p5, 1, 0 }
  0x17   : > { %s4640_s29 = scalar_select %p3966_p6, 1, 0 }
  0x18   : > { %4639 = sst [smem:[#allocation12_spill]] %s4638_s4  ;;  %p574_p8 = scmp.lt.s32.totalorder %s3798_s24, 3 }
  0x19   : > { %4641 = sst [smem:[#allocation13_spill]] %s4640_s29 }
  0x1a   : > { %p575_p9 = pnand %p3089_p7, %p574_p8 }
  0x1b   : > { %s4642_s21 = sld [smem:[#allocation16_spill]] (!%p575_p9)  ;;  %v3609_v1 = vld [vmem:[%s4588_s6 + $0x40] sm:$0xff] (!%p575_p9)   ;;  %v3613_v5 = vld [vmem:[%s4588_s6 + $0x48] sm:$0xff] (!%p575_p9)   ;;  %v3617_v9 = vld [vmem:[%s4588_s6 + $0x50] sm:$0xff] (!%p575_p9)   ;;  %p636_p10 = scmp.lt.s32.totalorder (!%p575_p9), %s3945_s2, 1  ;;  %v858_v21 = vlaneseq (!%p575_p9)  ;;  %v3800_v46 = vmov (!%p575_p9), 0.0  }
  0x1c   : > { %578 = sbr.rel (%p575_p9) target bundleno = 6664 (0x1a08), region = 100  ;;  %3266 = vmatprep.subr.bf16.mxu1 (!%p575_p9), %v3609_v1  ;;  %v3611_v3 = vld [vmem:[%s4588_s6] sm:$0xff] (!%p575_p9)   ;;  %v3615_v7 = vld [vmem:[%s4588_s6 + $0x8] sm:$0xff] (!%p575_p9)   ;;  %v3619_v11 = vld [vmem:[%s4588_s6 + $0x10] sm:$0xff] (!%p575_p9)   ;;  %s4644_s3 = sld [smem:[#allocation15_spill]] (!%p575_p9)  ;;  %vm3801_vm0 = vmmov (!%p575_p9), 0  }
  0x1d   : > { %3267 = vmatpush3.bf16.msra.mxu1 (!%p575_p9), %v3611_v3  ;;  %v3621_v13 = vld [vmem:[%s4588_s6 + $0x58] sm:$0xff] (!%p575_p9)   ;;  %v3625_v17 = vld [vmem:[%s4588_s6 + $0x60] sm:$0xff] (!%p575_p9)   ;;  %v3629_v22 = vld [vmem:[%s4588_s6 + $0x68] sm:$0xff] (!%p575_p9)   ;;  %v859_v26 = vshrl.u32 (!%p575_p9), %v858_v21, 7  ;;  %vm825_vm1 = vcmask (!%p575_p9), 261120   ;;  %s4646_s4 = sld [smem:[#allocation18_spill]] (!%p575_p9) }
  0x1e   : > { %3268 = vmatprep.subr.bf16.mxu1 (!%p575_p9), %v3613_v5  ;;  %v3623_v15 = vld [vmem:[%s4588_s6 + $0x18] sm:$0xff] (!%p575_p9)   ;;  %v3627_v19 = vld [vmem:[%s4588_s6 + $0x20] sm:$0xff] (!%p575_p9)   ;;  %v3631_v24 = vld [vmem:[%s4588_s6 + $0x28] sm:$0xff] (!%p575_p9)   ;;  %s3804_s19 = smov (!%p575_p9), 80   ;;  %s3806_s22 = smov (!%p575_p9), 88   ;;  %vm1294_vm2 = vcmask (!%p575_p9), 64512  }
  0x1f   : > { %v3633_v27 = vld [vmem:[%s4588_s6 + $0x70] sm:$0xff] (!%p575_p9)   ;;  %v4061_v31 = vsub.s32 (!%p575_p9), 0, %v859_v26  ;;  %v3637_v32 = vld [vmem:[%s4588_s6 + $0x78] sm:$0xff] (!%p575_p9)   ;;  %v4072_v33 = vsub.s32 (!%p575_p9), 1, %v859_v26  ;;  %v3640_v45 = vld [vmem:[%s4590_s8] sm:$0xff] (!%p575_p9)   ;;  %s4623_s0 = smov (!%p575_p9), 56  }
  0x20   : > { %v3635_v29 = vld [vmem:[%s4588_s6 + $0x30] sm:$0xff] (!%p575_p9)   ;;  %v3639_v35 = vld [vmem:[%s4588_s6 + $0x38] sm:$0xff] (!%p575_p9)   ;;  %v3641_v47 = vld [vmem:[%s4590_s8 + $0x8] sm:$0xff] (!%p575_p9)   ;;  %s4622_s27 = smov (!%p575_p9), 48   ;;  %s4620_s28 = smov (!%p575_p9), 64   ;;  %vm1359_vm3 = vcmask (!%p575_p9), 1043456  }
  0x21   : > { %v3608_v0 = vld [vmem:[%s4642_s21 + $0x40] sm:$0xff] (!%p575_p9)   ;;  %v3612_v4 = vld [vmem:[%s4642_s21 + $0x48] sm:$0xff] (!%p575_p9)   ;;  %v3616_v8 = vld [vmem:[%s4642_s21 + $0x50] sm:$0xff] (!%p575_p9)   ;;  %3269 = vmatpush3.bf16.msra.mxu1 (!%p575_p9), %v3615_v7  ;;  %s4619_s26 = smov (!%p575_p9), 40   ;;  %s4618_s29 = smov (!%p575_p9), 8   ;;  %vm1749_vm4 = vcmask (!%p575_p9), 130048  }
  0x22   : > { %3244 = vmatprep.subr.bf16.mxu0 (!%p575_p9), %v3608_v0  ;;  %v3610_v2 = vld [vmem:[%s4642_s21] sm:$0xff] (!%p575_p9)   ;;  %v3614_v6 = vld [vmem:[%s4642_s21 + $0x8] sm:$0xff] (!%p575_p9)   ;;  %v3618_v10 = vld [vmem:[%s4642_s21 + $0x10] sm:$0xff] (!%p575_p9)   ;;  %3270 = vmatprep.subr.bf16.mxu1 (!%p575_p9), %v3617_v9  ;;  %s4617_s30 = smov (!%p575_p9), 16   ;;  %vm1751_vm5 = vcmask (!%p575_p9), 195584  }
  0x23   : > { %3245 = vmatpush3.bf16.msra.mxu0 %v3610_v2  ;;  %v3620_v12 = vld [vmem:[%s4642_s21 + $0x58] sm:$0xff]   ;;  %v3624_v16 = vld [vmem:[%s4642_s21 + $0x60] sm:$0xff]   ;;  %v3628_v20 = vld [vmem:[%s4642_s21 + $0x68] sm:$0xff]   ;;  %s637_s23 = scalar_select %p636_p10, %s3945_s2, 1 }
  0x24   : > { %3246 = vmatprep.subr.bf16.mxu0 %v3612_v4  ;;  %v3622_v14 = vld [vmem:[%s4642_s21 + $0x18] sm:$0xff]   ;;  %v3626_v18 = vld [vmem:[%s4642_s21 + $0x20] sm:$0xff]   ;;  %v3630_v23 = vld [vmem:[%s4642_s21 + $0x28] sm:$0xff]   ;;  %s3807_s2 = smov 120  }
  0x25   : > { %3271 = vmatpush3.bf16.msra.mxu1 %v3619_v11  ;;  %v3632_v25 = vld [vmem:[%s4642_s21 + $0x70] sm:$0xff]   ;;  %s3243_s25 = sshll.u32 %s637_s23, 4  ;;  %s3093_s24 = sshll.u32 %s637_s23, 1  ;;  %v3636_v30 = vld [vmem:[%s4642_s21 + $0x78] sm:$0xff]   ;;  %v902_v54 = vld [vmem:[%s4589_s7] sm:$0x1] }
  0x26   : > { %3272 = vmatprep.subr.bf16.mxu1 %v3621_v13  ;;  %v3634_v28 = vld [vmem:[%s4642_s21 + $0x30] sm:$0xff]   ;;  %s4643_s23 = sld [smem:[#allocation14_spill]]  ;;  %s644_s1 = scalar_lea.vmem %s4644_s3, %s3093_s24  ;;  %v3638_v34 = vld [vmem:[%s4642_s21 + $0x38] sm:$0xff]   ;;  %v3644_v5 = vld [vmem:[%s4592_s10 + $0x4] ss:$8 sps:$4 sm:$0xff]   ;;  %v3802_v13 = vmov 0  }
  0x27   : > { %3247 = vmatpush3.bf16.msra.mxu0 %v3614_v6  ;;  %v856_v38 = vld [vmem:[%s644_s1] sm:$0x3]  ;;  %s3803_s3 = smov 96   ;;  %s4616_s1 = smov 24  }
  0x28   : > { %3248 = vmatprep.subr.bf16.mxu0 %v3616_v8  ;;  %v861_v41 = vrot.slane %v856_v38, %v4061_v31  ;;  %v865_v42 = vrot.slane %v856_v38, %v4072_v33  ;;  %v3642_v6 = vld [vmem:[%s4592_s10] ss:$8 sps:$4 sm:$0xff]   ;;  %v3647_v8 = vld [vmem:[%s4592_s10 + $0x14] ss:$8 sps:$4 sm:$0xff]   ;;  %s3817_s24 = smov 32  }
  0x29   : > { %3273 = vmatpush3.bf16.msra.mxu1 %v3623_v15  ;;  %v1051_v15 = vld [vmem:[%s4591_s9] sm:$0x1] }
  0x2a   : > { %3274 = vmatprep.subr.bf16.mxu1 %v3625_v17  ;;  %v868_v43 = vpack.c.bf16 %v861_v41, %v861_v41  ;;  %v869_v44 = vpack.c.bf16 %v865_v42, %v865_v42 }
  0x2b   : > { %3249 = vmatpush3.bf16.msra.mxu0 %v3618_v10  ;;  %v3645_v10 = vld [vmem:[%s4592_s10 + $0x10] ss:$8 sps:$4 sm:$0xff]  }
  0x2c   : > { %3250 = vmatprep.subr.bf16.mxu0 %v3620_v12  ;;  %s640_s20 = scalar_lea.vmem %s4643_s23, %s3243_s25  ;;  %1031 = vmatprep.mubr.bf16.mxu1 %v869_v44  ;;  %s4645_s25 = sld [smem:[#allocation17_spill]]  ;;  %v1119_v44 = vld [vmem:[%s4593_s11] sm:$0x3] }
  0x2d   : > { %3275 = vmatpush3.bf16.msra.mxu1 %v3627_v19  ;;  %v646_v36 = vld [vmem:[%s640_s20] sm:$0xff]  ;;  %v647_v37 = vld [vmem:[%s640_s20 + $0x8] sm:$0xff]  ;;  %s3805_s20 = smov 72  }
  0x2e   : > { %3276 = vmatprep.subr.bf16.mxu1 %v3629_v22  ;;  %v648_v39 = vpack.c.bf16 %v646_v36, %v646_v36  ;;  %v649_v40 = vpack.c.bf16 %v647_v37, %v647_v37 }
  0x2f   : > { %3251 = vmatpush3.bf16.msra.mxu0 %v3622_v14 }
  0x30   : > { %3252 = vmatprep.subr.bf16.mxu0 %v3624_v16  ;;  %817 = vmatprep.mubr.bf16.mxu0 %v649_v40 }
  0x31   : > { %3277 = vmatpush3.bf16.msra.mxu1 %v3631_v24 }
  0x32   : > { %3278 = vmatprep.subr.bf16.mxu1 %v3633_v27  ;;  %v3094_v50 = vld [vmem:[%s4645_s25] ss:$0 sm:$0xff]  ;;  %s3809_s25 = smov 104  }
  0x33   : > { %3253 = vmatpush3.bf16.msra.mxu0 %v3626_v18 }
  0x34   : > { %3254 = vmatprep.subr.bf16.mxu0 %v3628_v20 }
  0x35   : > { %3279 = vmatpush3.bf16.msra.mxu1 %v3635_v29 }
  0x36   : > { %3280 = vmatprep.subr.bf16.mxu1 %v3637_v32  ;;  %v3111_v32 = vld [vmem:[%s4646_s4] ss:$0 sm:$0xff]  ;;  %s3808_s4 = smov 112  }
  0x37   : > { %3255 = vmatpush3.bf16.msra.mxu0 %v3630_v23 }
  0x38   : > { %3256 = vmatprep.subr.bf16.mxu0 %v3632_v25 }
  0x39   : > { %3281 = vmatpush3.bf16.msra.mxu1 %v3639_v35  ;;  %v3112_v35 = vld [vmem:[%s4587_s5] ss:$0 sm:$0xff] }
  0x3a   : > { %3375 = vmatprep.subr.bf16.mxu1 %v3800_v46 }
  0x3b   : > { %3257 = vmatpush3.bf16.msra.mxu0 %v3634_v28 }
  0x3c   : > { %3258 = vmatprep.subr.bf16.mxu0 %v3636_v30  ;;  %1032 = vmatmul.mubr.bf16.vlgmr.msra.gmra.mrb[0].mxu1 %v868_v43 }
  0x3d   : > { %3377 = vmatprep.mubr.msk.bf16.mxu1 %vm3801_vm0, %v3800_v46 }
  0x3f   : > { %3259 = vmatpush3.bf16.msra.mxu0 %v3638_v34 }
  0x40   : > { %3359 = vmatprep.subr.bf16.mxu0 %v3800_v46 }
  0x42   : > { %818 = vmatmul.mubr.bf16.vlgmr.msra.gmra.mrb[0].mxu0 %v648_v39 }
  0x43   : > { %3360 = vmatpush3.bf16.msra.mxu0 %v3640_v45  ;;  %3363 = vmatprep.mubr.msk.bf16.mxu0 %vm3801_vm0, %v3800_v46  ;;  %v1144_v45 = vrot.slane %v1119_v44, %v4061_v31 }
  0x44   : > { %3361 = vmatprep.subr.bf16.mxu0 %v3800_v46 }
  0x47   : > { %3362 = vmatpush3.bf16.msra.mxu0 %v3641_v47  ;;  %v1148_v47 = vrot.slane %v1119_v44, %v4072_v33 }
  0x48   : > { %1154 = vmatprep.subr.bf16.mxu0 %v3644_v5 }
 0x10f   : > { %v3282_v51 = vpop.f32.mrb[0].mxu1 }
 0x110   : > { %v3283_v55 = vpop.f32.mrb[1].mxu1 }
 0x111   : > { %v3284_v57 = vadd.f32 %v3283_v55, %v3282_v51  ;;  %v3285_v59 = vpop.f32.mrb[2].mxu1 }
 0x112   : > { %v3286_v60 = vpop.f32.mrb[3].mxu1 }
 0x113   : > { %v1034_v61 = vadd.f32 %v3284_v57, %v902_v54  ;;  %v3649_v57 = vld [vmem:[%s4594_s12 + $0x8] sm:$0xff]  }
 0x115   : > { %v3260_v48 = vpop.f32.mrb[0].mxu0  ;;  %v3129_v63 = vmul.f32 -1.442695, %v1034_v61 }
 0x116   : > { %v3261_v49 = vpop.f32.mrb[1].mxu0 }
 0x117   : > { %v3262_v52 = vadd.f32 %v3261_v49, %v3260_v48  ;;  %v3263_v53 = vpop.f32.mrb[2].mxu0  ;;  %3682 = vpow2.f32 %v3129_v63 }
 0x118   : > { %v3264_v56 = vpop.f32.mrb[3].mxu0 }
 0x119   : > { %v820_v58 = vadd.f32 %v3262_v52, %v3094_v50  ;;  %v3648_v56 = vld [vmem:[%s4594_s12] sm:$0xff]  }
 0x11b   : > { %v826_v62 = vsel %vm825_vm1, %v820_v58, 0.0 }
 0x11c   : > { %827 = vadd.xlane.f32.xlu0 %v826_v62 }
 0x121   : > { %v3683_v0 = vpop.eup %3682 }
 0x122   : > { %v1042_v1 = vadd.f32 1.0, %v3683_v0 }
 0x124   : > { %3684 = vrcp.f32 %v1042_v1 }
 0x12e   : > { %v3685_v2 = vpop.eup %3684 }
 0x12f   : > { %v1045_v3 = vmul.f32 %v3685_v2, %v1034_v61 }
 0x131   : > { %v1046_v4 = vpack.c.bf16 %v1045_v3, %v1045_v3 }
 0x133   : > { %3364 = vmatmul.mubr.msk.bf16.vlgmr.msra.gmra.mrb[4].mxu0 %vm825_vm1, %v1046_v4  ;;  %v3139_v4 = vld [vmem:[%s4595_s13] ss:$0 sm:$0xff] }
 0x134   : > { %1155 = vmatpush1.bf16.msra.mxu0 %v3642_v6  ;;  %1186 = vmatprep.mubr.bf16.mxu0 %v3802_v13 }
 0x135   : > { %1156 = vmatprep.subr.bf16.mxu0 %v3647_v8 }
 0x138   : > { %1157 = vmatpush1.bf16.msra.mxu0 %v3645_v10 }
 0x139   : > { %3367 = vmatprep.subr.bf16.mxu0 %v3800_v46 }
 0x1a9   : > { %v828_v7 = vpop.xlane.xlu0 %827 }
 0x1aa   : > { %v830_v9 = vmul.f32 0.03125, %v828_v7 }
 0x1ac   : > { %v831_v11 = vsub.f32 %v820_v58, %v830_v9 }
 0x1ae   : > { %v832_v12 = vmul.f32 %v831_v11, %v831_v11 }
 0x1b0   : > { %v833_v14 = vsel %vm825_vm1, %v832_v12, 0.0 }
 0x1b1   : > { %834 = vadd.xlane.f32.xlu0 %v833_v14 }
 0x206   : > { %v1101_v16 = vpop.f32.mrb[4].mxu0 }
 0x207   : > { %v1102_v17 = vadd.f32 %v1101_v16, %v1051_v15  ;;  %v3365_v18 = vpop.f32.mrb[5].mxu0 }
 0x208   : > { %v1104_v19 = vpop.f32.mrb[6].mxu0 }
 0x209   : > { %v3133_v20 = vmul.f32 -1.442695, %v1102_v17  ;;  %v3366_v21 = vpop.f32.mrb[7].mxu0 }
 0x20b   : > { %3686 = vpow2.f32 %v3133_v20 }
 0x215   : > { %v3687_v22 = vpop.eup %3686 }
 0x216   : > { %v1110_v23 = vadd.f32 1.0, %v3687_v22 }
 0x218   : > { %3688 = vrcp.f32 %v1110_v23 }
 0x222   : > { %v3689_v24 = vpop.eup %3688 }
 0x223   : > { %v1113_v25 = vmul.f32 %v3689_v24, %v1102_v17 }
 0x225   : > { %v4121_v26 = vpack.c.bf16 %v1113_v25, %v1113_v25 }
 0x227   : > { %3138 = vmatmul.mubr.msk.bf16.vlgmr.msra.gmra.mrb[8].mxu0 %vm825_vm1, %v4121_v26 }
 0x228   : > { %3371 = vmatprep.mubr.msk.bf16.mxu0 %vm3801_vm0, %v3800_v46  ;;  %3368 = vmatpush3.bf16.msra.mxu0 %v3648_v56 }
 0x229   : > { %3369 = vmatprep.subr.bf16.mxu0 %v3800_v46 }
 0x22c   : > { %3370 = vmatpush3.bf16.msra.mxu0 %v3649_v57 }
 0x22d   : > { %3381 = vmatprep.subr.bf16.mxu0 %v3800_v46 }
 0x23e   : > { %v835_v27 = vpop.xlane.xlu0 %834 }
 0x23f   : > { %v836_v28 = vmul.f32 0.03125, %v835_v27 }
 0x241   : > { %v837_v29 = vadd.f32 1e-05, %v836_v28 }
 0x243   : > { %3690 = vrsqrt.f32 %v837_v29 }
 0x24d   : > { %v3691_v30 = vpop.eup %3690 }
 0x24e   : > { %v839_v34 = vmul.f32 %v3691_v30, %v831_v11 }
 0x250   : > { %v847_v36 = vmul.f32 %v3111_v32, %v839_v34 }
 0x252   : > { %v4133_v37 = vadd.f32 %v3112_v35, %v847_v36 }
 0x254   : > { %v1195_v38 = vsel %vm825_vm1, %v4133_v37, 0.0 }
 0x255   : > { %1196 = vadd.xlane.f32.xlu1 %v1195_v38 }
 0x2e2   : > { %v1197_v39 = vpop.xlane.xlu1 %1196 }
 0x2e3   : > { %v1198_v40 = vmul.f32 0.03125, %v1197_v39 }
 0x2e5   : > { %v1199_v41 = vsub.f32 %v4133_v37, %v1198_v40 }
 0x2e7   : > { %v1200_v42 = vmul.f32 %v1199_v41, %v1199_v41 }
 0x2e9   : > { %v1201_v43 = vsel %vm825_vm1, %v1200_v42, 0.0 }
 0x2ea   : > { %1202 = vadd.xlane.f32.xlu1 %v1201_v43 }
 0x2fa   : > { %v1188_v48 = vpop.f32.mrb[8].mxu0 }
 0x2fb   : > { %v1189_v49 = vadd.f32 %v1188_v48, %v1144_v45  ;;  %v1190_v50 = vpop.f32.mrb[9].mxu0 }
 0x2fc   : > { %v4144_v51 = vadd.f32 %v1190_v50, %v1148_v47  ;;  %v1192_v52 = vpop.f32.mrb[10].mxu0 }
 0x2fd   : > { %v1208_v53 = vadd.f32 1.0, %v1189_v49  ;;  %v1193_v54 = vpop.f32.mrb[11].mxu0  ;;  %v4157_v0 = vrot.slane %v1189_v49, %v4061_v31 }
 0x2ff   : > { %v1212_v55 = vrot.slane %v1208_v53, %v4061_v31 }
 0x301   : > { %1214 = vrot.lane.b32.xlu0 %v1212_v55, %s3803_s3 }
 0x373   : > { %v1215_v63 = vpop.permute.xlu0 %1214 }
 0x377   : > { %v1203_v58 = vpop.xlane.xlu1 %1202 }
 0x378   : > { %v1204_v59 = vmul.f32 0.03125, %v1203_v58 }
 0x37a   : > { %v1205_v60 = vadd.f32 1e-06, %v1204_v59 }
 0x37c   : > { %3692 = vrsqrt.f32 %v1205_v60 }
 0x386   : > { %v3693_v61 = vpop.eup %3692 }
 0x387   : > { %v1207_v62 = vmul.f32 %v3693_v61, %v1199_v41 }
 0x389   : > { %v1217_v1 = vmul.f32 %v1215_v63, %v1207_v62 }
 0x38b   : > { %v1222_v2 = vadd.f32 %v4157_v0, %v1217_v1 }
 0x38d   : > { %v1223_v3 = vpack.c.bf16 %v1222_v2, %v1222_v2 }
 0x38f   : > { %3372 = vmatmul.mubr.msk.bf16.vlgmr.msra.gmra.mrb[12].mxu0 %vm825_vm1, %v1223_v3 }
 0x390   : > { %3383 = vmatprep.mubr.msk.bf16.mxu0 %vm3801_vm0, %v3800_v46 }
 0x462   : > { %v1284_v5 = vpop.f32.mrb[12].mxu0 }
 0x463   : > { %v1285_v6 = vadd.f32 %v3139_v4, %v1284_v5  ;;  %v3373_v7 = vpop.f32.mrb[13].mxu0 }
 0x464   : > { %v1287_v8 = vpop.f32.mrb[14].mxu0 }
 0x465   : > { %v4166_v9 = vpack.c.bf16 %v1285_v6, %v1285_v6  ;;  %v3374_v10 = vpop.f32.mrb[15].mxu0 }
 0x467   : > { %1516 = vrot.lane.b32.xlu0 %v4166_v9, %s3804_s19  ;;  %1292 = vrot.lane.b32.xlu1 %v4166_v9, %s3803_s3 }
 0x46b   : > { %1627 = vrot.lane.b32.xlu0 %v4166_v9, %s3805_s20  ;;  %1405 = vrot.lane.b32.xlu1 %v4166_v9, %s3806_s22 }
 0x46f   : > { %1403 = vrot.lane.b32.xlu1 %v4166_v9, %s3807_s2 }
 0x473   : > { %1514 = vrot.lane.b32.xlu1 %v4166_v9, %s3808_s4 }
 0x477   : > { %1625 = vrot.lane.b32.xlu1 %v4166_v9, %s3809_s25 }
 0x4d9   : > { %v1293_v11 = vpop.permute.xlu1 %1292  ;;  %v1517_v16 = vpop.permute.xlu0 %1516 }
 0x4da   : > { %v1299_v12 = vsel %vm1294_vm2, %v1293_v11, 0  ;;  %v1522_v18 = vsel %vm1294_vm2, %v1517_v16, 0 }
 0x4db   : > { %3376 = vmatpush3.bf16.xpose.msra.mxu1 %v1299_v12 }
 0x4dc   : > { %3387 = vmatprep.subr.bf16.mxu1 %v3800_v46 }
 0x4dd   : > { %v1406_v14 = vpop.permute.xlu1 %1405  ;;  %v1628_v19 = vpop.permute.xlu0 %1627 }
 0x4de   : > { %v1411_v15 = vsel %vm1294_vm2, %v1406_v14, 0  ;;  %v1633_v21 = vsel %vm1294_vm2, %v1628_v19, 0 }
 0x4e1   : > { %v1404_v17 = vpop.permute.xlu1 %1403 }
 0x4e2   : > { %3378 = vmatmul.mubr.msk.bf16.vlgmr.msra.gmra.mrb[4].mxu1 %vm1294_vm2, %v4166_v9 }
 0x4e3   : > { %3388 = vmatpush3.bf16.xpose.msra.mxu1 %v1411_v15  ;;  %3389 = vmatprep.mubr.msk.bf16.mxu1 %vm3801_vm0, %v3800_v46 }
 0x4e4   : > { %3399 = vmatprep.subr.bf16.mxu1 %v3800_v46 }
 0x4e5   : > { %v1515_v20 = vpop.permute.xlu1 %1514 }
 0x4e9   : > { %v1626_v22 = vpop.permute.xlu1 %1625 }
 0x4ea   : > { %3390 = vmatmul.mubr.msk.bf16.vlgmr.msra.gmra.mrb[8].mxu1 %vm1294_vm2, %v1404_v17 }
 0x4eb   : > { %3400 = vmatpush3.bf16.xpose.msra.mxu1 %v1522_v18  ;;  %3401 = vmatprep.mubr.msk.bf16.mxu1 %vm3801_vm0, %v3800_v46 }
 0x4ec   : > { %3411 = vmatprep.subr.bf16.mxu1 %v3800_v46 }
 0x4f2   : > { %3402 = vmatmul.mubr.msk.bf16.vlgmr.msra.gmra.mrb[12].mxu1 %vm1294_vm2, %v1515_v20 }
 0x4f3   : > { %3412 = vmatpush3.bf16.xpose.msra.mxu1 %v1633_v21  ;;  %3413 = vmatprep.mubr.msk.bf16.mxu1 %vm3801_vm0, %v3800_v46 }
 0x4f4   : > { %3423 = vmatprep.subr.bf16.mxu1 %v3800_v46 }
 0x4fa   : > { %3414 = vmatmul.mubr.msk.bf16.vlgmr.msra.gmra.mrb[16].mxu1 %vm1294_vm2, %v1626_v22 }
 0x4fb   : > { %3427 = vmatprep.mubr.msk.bf16.mxu1 %vm3801_vm0, %v3800_v46 }
 0x5b5   : > { %v1335_v23 = vpop.f32.mrb[4].mxu1 }
 0x5b6   : > { %v1341_v24 = vmul.f32 0.35355338, %v1335_v23  ;;  %v3379_v25 = vpop.f32.mrb[5].mxu1 }
 0x5b7   : > { %v1338_v27 = vpop.f32.mrb[6].mxu1 }
 0x5b8   : > { %v3380_v28 = vpop.f32.mrb[7].mxu1  ;;  %v1342_v29 = vsel %vm1294_vm2, %v1341_v24, -inf }
 0x5b9   : > { %1343 = vmax.xlane.f32.xlu0 %v1342_v29 }
 0x5bd   : > { %v1447_v30 = vpop.f32.mrb[8].mxu1 }
 0x5be   : > { %v1453_v32 = vmul.f32 0.35355338, %v1447_v30  ;;  %v3391_v34 = vpop.f32.mrb[9].mxu1 }
 0x5bf   : > { %v1450_v35 = vpop.f32.mrb[10].mxu1 }
 0x5c0   : > { %v3392_v36 = vpop.f32.mrb[11].mxu1  ;;  %v1454_v38 = vsel %vm1294_vm2, %v1453_v32, -inf }
 0x5c1   : > { %1455 = vmax.xlane.f32.xlu1 %v1454_v38 }
 0x5c5   : > { %v1558_v39 = vpop.f32.mrb[12].mxu1 }
 0x5c6   : > { %v1564_v40 = vmul.f32 0.35355338, %v1558_v39  ;;  %v3403_v41 = vpop.f32.mrb[13].mxu1 }
 0x5c7   : > { %v1561_v42 = vpop.f32.mrb[14].mxu1 }
 0x5c8   : > { %v3404_v43 = vpop.f32.mrb[15].mxu1  ;;  %v1565_v44 = vsel %vm1294_vm2, %v1564_v40, -inf }
 0x5c9   : > { %1566 = vmax.xlane.f32.xlu0 %v1565_v44  ;;  %v3650_v43 = vld [vmem:[%s4596_s14] sm:$0xff]  }
 0x5ca   : > { %3424 = vmatpush3.bf16.msra.mxu1 %v3650_v43  ;;  %v3666_v43 = vld [vmem:[%s4600_s18 + $0x30] sm:$0xff]  }
 0x5cb   : > { %3425 = vmatprep.subr.bf16.mxu1 %v3800_v46 }
 0x5cd   : > { %v1669_v45 = vpop.f32.mrb[16].mxu1 }
 0x5ce   : > { %v1675_v47 = vmul.f32 0.35355338, %v1669_v45  ;;  %v3415_v48 = vpop.f32.mrb[17].mxu1 }
 0x5cf   : > { %v1672_v49 = vpop.f32.mrb[18].mxu1 }
 0x5d0   : > { %v3416_v50 = vpop.f32.mrb[19].mxu1  ;;  %v1676_v52 = vsel %vm1294_vm2, %v1675_v47, -inf }
 0x5d1   : > { %1677 = vmax.xlane.f32.xlu0 %v1676_v52 }
 0x646   : > { %v1344_v53 = vpop.xlane.xlu0 %1343 }
 0x647   : > { %v1345_v54 = vsub.f32 %v1341_v24, %v1344_v53 }
 0x649   : > { %v1346_v55 = vmul.f32 1.442695, %v1345_v54  ;;  %v3651_v54 = vld [vmem:[%s4596_s14 + $0x8] sm:$0xff]  }
 0x64a   : > { %3426 = vmatpush3.bf16.msra.mxu1 %v3651_v54  ;;  %v3172_v54 = vld [vmem:[%s4593_s11 + $0x2] sm:$0x3] }
 0x64b   : > { %3694 = vpow2.f32 %v1346_v55  ;;  %3439 = vmatprep.subr.bf16.mxu1 %v3800_v46 }
 0x64e   : > { %v1456_v56 = vpop.xlane.xlu1 %1455 }
 0x64f   : > { %v1457_v57 = vsub.f32 %v1453_v32, %v1456_v56 }
 0x651   : > { %v1458_v58 = vmul.f32 1.442695, %v1457_v57 }
 0x653   : > { %3696 = vpow2.f32 %v1458_v58 }
 0x655   : > { %v3695_v59 = vpop.eup %3694 }
 0x656   : > { %v1567_v60 = vpop.xlane.xlu0 %1566  ;;  %v1348_v61 = vsel %vm1294_vm2, %v3695_v59, 0.0 }
 0x657   : > { %v1568_v62 = vsub.f32 %v1564_v40, %v1567_v60  ;;  %1349 = vadd.xlane.f32.xlu0 %v1348_v61 }
 0x659   : > { %v1569_v63 = vmul.f32 1.442695, %v1568_v62 }
 0x65b   : > { %3698 = vpow2.f32 %v1569_v63 }
 0x65d   : > { %v3697_v1 = vpop.eup %3696 }
 0x65e   : > { %v1460_v2 = vsel %vm1294_vm2, %v3697_v1, 0.0  ;;  %v1678_v5 = vpop.xlane.xlu0 %1677 }
 0x65f   : > { %1461 = vadd.xlane.f32.xlu1 %v1460_v2  ;;  %v1679_v6 = vsub.f32 %v1675_v47, %v1678_v5 }
 0x661   : > { %v1680_v7 = vmul.f32 1.442695, %v1679_v6 }
 0x663   : > { %3700 = vpow2.f32 %v1680_v7 }
 0x665   : > { %v3699_v3 = vpop.eup %3698 }
 0x666   : > { %v1571_v4 = vsel %vm1294_vm2, %v3699_v3, 0.0 }
 0x667   : > { %1572 = vadd.xlane.f32.xlu0 %v1571_v4 }
 0x66d   : > { %v3701_v8 = vpop.eup %3700 }
 0x66e   : > { %v1682_v10 = vsel %vm1294_vm2, %v3701_v8, 0.0 }
 0x670   : > { %1466 = vrot.lane.b32.xlu1 %v4166_v9, %s4623_s0  ;;  %s4647_s0 = sld [smem:[#allocation19_spill]] }
 0x674   : > { %1577 = vrot.lane.b32.xlu1 %v4166_v9, %s4622_s27  ;;  %s4653_s27 = smov 16  }
 0x67d   : > { %1354 = vrot.lane.b32.xlu0 %v4166_v9, %s4620_s28 }
 0x698   : > { %1683 = vadd.xlane.f32.xlu1 %v1682_v10 }
 0x6a9   : > { %1688 = vrot.lane.b32.xlu1 %v4166_v9, %s4619_s26  ;;  %s4652_s26 = smov 8  }
 0x6e4   : > { %v1350_v11 = vpop.xlane.xlu0 %1349 }
 0x6e5   : > { %3702 = vrcp.f32 %v1350_v11 }
 0x6ec   : > { %v1462_v12 = vpop.xlane.xlu1 %1461 }
 0x6ed   : > { %3704 = vrcp.f32 %v1462_v12 }
 0x6ef   : > { %v3703_v14 = vpop.eup %3702 }
 0x6f0   : > { %v1352_v16 = vmul.f32 %v3703_v14, %v3695_v59  ;;  %v1467_v19 = vpop.permute.xlu1 %1466 }
 0x6f1   : > { %v1472_v9 = vsel %vm1359_vm3, %v1467_v19, 0 }
 0x6f2   : > { %v1353_v20 = vpack.c.bf16 %v1352_v16, %v1352_v16 }
 0x6f4   : > { %v1573_v15 = vpop.xlane.xlu0 %1572  ;;  %v1578_v23 = vpop.permute.xlu1 %1577 }
 0x6f5   : > { %3706 = vrcp.f32 %v1573_v15  ;;  %v1583_v27 = vsel %vm1359_vm3, %v1578_v23, 0 }
 0x6f7   : > { %v3705_v21 = vpop.eup %3704 }
 0x6f8   : > { %v1355_v17 = vpop.permute.xlu0 %1354  ;;  %v1464_v22 = vmul.f32 %v3705_v21, %v3697_v1  ;;  %v3653_v21 = vld [vmem:[%s4598_s16 + $0x8] sm:$0xff]  }
 0x6f9   : > { %v1361_v18 = vsel %vm1359_vm3, %v1355_v17, 0 }
 0x6fa   : > { %3382 = vmatpush3.bf16.msra.mxu0 %v1361_v18  ;;  %v1465_v24 = vpack.c.bf16 %v1464_v22, %v1464_v22 }
 0x6fb   : > { %3393 = vmatprep.subr.bf16.mxu0 %v3800_v46 }
 0x6fd   : > { %3384 = vmatmul.mubr.msk.bf16.vlgmr.msra.gmra.mrb[16].mxu0 %vm1294_vm2, %v1353_v20 }
 0x6fe   : > { %3394 = vmatpush3.bf16.msra.mxu0 %v1472_v9  ;;  %3395 = vmatprep.mubr.msk.bf16.mxu0 %vm3801_vm0, %v3800_v46  ;;  %v3656_v9 = vld [vmem:[%s4592_s10 + $0x24] ss:$8 sps:$4 sm:$0xff]  }
 0x6ff   : > { %3405 = vmatprep.subr.bf16.mxu0 %v3800_v46  ;;  %v3707_v25 = vpop.eup %3706 }
 0x700   : > { %v1575_v28 = vmul.f32 %v3707_v25, %v3699_v3  ;;  %v3151_v3 = vld [vmem:[%s4597_s15] ss:$0 sm:$0xff]  ;;  %v1843_v25 = vadd.f32 1.0, %v4144_v51 }
 0x702   : > { %v1576_v29 = vpack.c.bf16 %v1575_v28, %v1575_v28 }
 0x705   : > { %3396 = vmatmul.mubr.msk.bf16.vlgmr.msra.gmra.mrb[20].mxu0 %vm1294_vm2, %v1465_v24 }
 0x706   : > { %3406 = vmatpush3.bf16.msra.mxu0 %v1583_v27  ;;  %3407 = vmatprep.mubr.msk.bf16.mxu0 %vm3801_vm0, %v3800_v46 }
 0x707   : > { %3417 = vmatprep.subr.bf16.mxu0 %v3800_v46 }
 0x70d   : > { %3408 = vmatmul.mubr.msk.bf16.vlgmr.msra.gmra.mrb[24].mxu0 %vm1294_vm2, %v1576_v29  ;;  %v1847_v29 = vrot.slane %v1843_v25, %v4061_v31  ;;  %v3668_v25 = vld [vmem:[%s4594_s12 + $0x10] sm:$0xff]  }
 0x70e   : > { %3419 = vmatprep.mubr.msk.bf16.mxu0 %vm3801_vm0, %v3800_v46 }
 0x725   : > { %v1684_v30 = vpop.xlane.xlu1 %1683 }
 0x726   : > { %3708 = vrcp.f32 %v1684_v30 }
 0x729   : > { %v1689_v32 = vpop.permute.xlu1 %1688 }
 0x72a   : > { %v1694_v34 = vsel %vm1359_vm3, %v1689_v32, 0 }
 0x72b   : > { %3418 = vmatpush3.bf16.msra.mxu0 %v1694_v34 }
 0x72c   : > { %3431 = vmatprep.subr.bf16.mxu0 %v3800_v46 }
 0x730   : > { %v3709_v35 = vpop.eup %3708 }
 0x731   : > { %v1686_v36 = vmul.f32 %v3709_v35, %v3701_v8  ;;  %v3654_v35 = vld [vmem:[%s4592_s10 + $0x20] ss:$8 sps:$4 sm:$0xff]  }
 0x733   : > { %v1687_v38 = vpack.c.bf16 %v1686_v36, %v1686_v36 }
 0x735   : > { %3420 = vmatmul.mubr.msk.bf16.vlgmr.msra.gmra.mrb[28].mxu0 %vm1294_vm2, %v1687_v38  ;;  %v3659_v38 = vld [vmem:[%s4592_s10 + $0x34] ss:$8 sps:$4 sm:$0xff]  }
 0x736   : > { %3435 = vmatprep.mubr.msk.bf16.mxu0 %vm3801_vm0, %v3800_v46 }
 0x7d0   : > { %v1397_v39 = vpop.f32.mrb[16].mxu0 }
 0x7d1   : > { %v3385_v40 = vpop.f32.mrb[17].mxu0 }
 0x7d2   : > { %v1400_v41 = vpop.f32.mrb[18].mxu0  ;;  %v3661_v40 = vld [vmem:[%s4600_s18 + $0x8] sm:$0xff]  }
 0x7d3   : > { %v3386_v42 = vpop.f32.mrb[19].mxu0  ;;  %v3664_v41 = vld [vmem:[%s4600_s18 + $0x20] sm:$0xff]  }
 0x7d4   : > { %v3665_v42 = vld [vmem:[%s4600_s18 + $0x28] sm:$0xff]  }
 0x7d8   : > { %v1508_v44 = vpop.f32.mrb[20].mxu0 }
 0x7d9   : > { %1737 = vrot.lane.b32.xlu0 %v1508_v44, %s4618_s29  ;;  %v3397_v45 = vpop.f32.mrb[21].mxu0  ;;  %v3667_v44 = vld [vmem:[%s4600_s18 + $0x38] sm:$0xff]  }
 0x7da   : > { %v1511_v47 = vpop.f32.mrb[22].mxu0  ;;  %v3155_v45 = vld [vmem:[%s4599_s17] ss:$0 sm:$0xff] }
 0x7db   : > { %v3398_v48 = vpop.f32.mrb[23].mxu0 }
 0x7e0   : > { %v1619_v49 = vpop.f32.mrb[24].mxu0 }
 0x7e1   : > { %1741 = vrot.lane.b32.xlu1 %v1619_v49, %s4617_s30  ;;  %v3409_v50 = vpop.f32.mrb[25].mxu0  ;;  %s4655_s30 = sld [smem:[#allocation6_spill]] }
 0x7e2   : > { %v1622_v52 = vpop.f32.mrb[26].mxu0 }
 0x7e3   : > { %v3410_v53 = vpop.f32.mrb[27].mxu0 }
 0x808   : > { %v1730_v55 = vpop.f32.mrb[28].mxu0 }
 0x809   : > { %1745 = vrot.lane.b32.xlu0 %v1730_v55, %s4616_s1  ;;  %v3421_v56 = vpop.f32.mrb[29].mxu0  ;;  %s4654_s1 = smov 24  }
 0x80a   : > { %v1733_v57 = vpop.f32.mrb[30].mxu0  ;;  %v2091_v56 = vrot.slane %v3172_v54, %v4072_v33  ;;  %v3159_v33 = vld [vmem:[%s4647_s0] ss:$0 sm:$0xff] }
 0x80b   : > { %v3422_v58 = vpop.f32.mrb[31].mxu0 }
 0x84b   : > { %v1738_v59 = vpop.permute.xlu0 %1737 }
 0x84c   : > { %v1748_v61 = vsel %vm1294_vm2, %v1397_v39, %v1738_v59  ;;  %v3657_v39 = vld [vmem:[%s4592_s10 + $0x30] ss:$8 sps:$4 sm:$0xff]  }
 0x853   : > { %v1742_v60 = vpop.permute.xlu1 %1741 }
 0x854   : > { %v1750_v62 = vsel %vm1749_vm4, %v1748_v61, %v1742_v60 }
 0x87b   : > { %v1746_v63 = vpop.permute.xlu0 %1745 }
 0x87c   : > { %v1752_v1 = vsel %vm1751_vm5, %v1750_v62, %v1746_v63 }
 0x87d   : > { %v1753_v2 = vpack.c.bf16 %v1752_v1, %v1752_v1 }
 0x87f   : > { %3428 = vmatmul.mubr.msk.bf16.vlgmr.msra.gmra.mrb[20].mxu1 %vm825_vm1, %v1753_v2 }
 0x880   : > { %3455 = vmatprep.mubr.msk.bf16.mxu1 %vm3801_vm0, %v3800_v46 }
 0x952   : > { %v1814_v4 = vpop.f32.mrb[20].mxu1 }
 0x953   : > { %v1815_v5 = vadd.f32 %v3151_v3, %v1814_v4  ;;  %v3429_v6 = vpop.f32.mrb[21].mxu1 }
 0x954   : > { %v1817_v7 = vpop.f32.mrb[22].mxu1 }
 0x955   : > { %1821 = vrot.lane.b32.xlu1 %v1815_v5, %s4620_s28  ;;  %v3430_v8 = vpop.f32.mrb[23].mxu1 }
 0x9c7   : > { %v1822_v10 = vpop.permute.xlu1 %1821 }
 0x9c8   : > { %v1824_v11 = vmul.f32 %v1822_v10, %v4157_v0 }
 0x9ca   : > { %1826 = vrot.lane.b32.xlu0 %v1824_v11, %s4620_s28 }
 0xa3c   : > { %v1827_v12 = vpop.permute.xlu0 %1826 }
 0xa3d   : > { %v4263_v14 = vadd.f32 %v1827_v12, %v4133_v37  ;;  %v3652_v37 = vld [vmem:[%s4598_s16] sm:$0xff]  }
 0xa3e   : > { %3432 = vmatpush3.bf16.msra.mxu0 %v3652_v37  ;;  %v2087_v37 = vrot.slane %v3172_v54, %v4061_v31 }
 0xa3f   : > { %v1830_v15 = vsel %vm825_vm1, %v4263_v14, 0.0  ;;  %3433 = vmatprep.subr.bf16.mxu0 %v3800_v46 }
 0xa40   : > { %1831 = vadd.xlane.f32.xlu1 %v1830_v15  ;;  %v2045_v15 = vrot.slane %v4144_v51, %v4061_v31 }
 0xa42   : > { %3434 = vmatpush3.bf16.msra.mxu0 %v3653_v21 }
 0xa43   : > { %2094 = vmatprep.subr.bf16.mxu0 %v3656_v9 }
 0xacd   : > { %v1832_v16 = vpop.xlane.xlu1 %1831 }
 0xace   : > { %v1833_v17 = vmul.f32 0.03125, %v1832_v16 }
 0xad0   : > { %v1834_v18 = vsub.f32 %v4263_v14, %v1833_v17 }
 0xad2   : > { %v1835_v19 = vmul.f32 %v1834_v18, %v1834_v18 }
 0xad4   : > { %v1836_v20 = vsel %vm825_vm1, %v1835_v19, 0.0 }
 0xad5   : > { %1837 = vadd.xlane.f32.xlu0 %v1836_v20 }
 0xaeb   : > { %1850 = vrot.lane.b32.xlu0 %v4157_v0, %s3817_s24  ;;  %v3660_v0 = vld [vmem:[%s4600_s18] sm:$0xff]  }
 0xaec   : > { %3440 = vmatpush3.bf16.msra.mxu1 %v3660_v0 }
 0xaed   : > { %3441 = vmatprep.subr.bf16.mxu1 %v3800_v46 }
 0xaf0   : > { %3442 = vmatpush3.bf16.msra.mxu1 %v3661_v40 }
 0xaf1   : > { %3443 = vmatprep.subr.bf16.mxu1 %v3800_v46 }
 0xb62   : > { %v1838_v22 = vpop.xlane.xlu0 %1837 }
 0xb63   : > { %v1839_v23 = vmul.f32 0.03125, %v1838_v22 }
 0xb65   : > { %v1840_v24 = vadd.f32 1e-06, %v1839_v23 }
 0xb66   : > { %v1851_v32 = vpop.permute.xlu0 %1850 }
 0xb67   : > { %3710 = vrsqrt.f32 %v1840_v24 }
 0xb71   : > { %v3711_v27 = vpop.eup %3710 }
 0xb72   : > { %v1842_v28 = vmul.f32 %v3711_v27, %v1834_v18  ;;  %v3669_v27 = vld [vmem:[%s4594_s12 + $0x18] sm:$0xff]  }
 0xb74   : > { %v1848_v30 = vmul.f32 %v1847_v29, %v1842_v28 }
 0xb76   : > { %v1853_v34 = vadd.f32 %v1851_v32, %v1848_v30 }
 0xb78   : > { %v1854_v36 = vpack.c.bf16 %v1853_v34, %v1853_v34 }
 0xb7a   : > { %3436 = vmatmul.mubr.msk.bf16.vlgmr.msra.gmra.mrb[32].mxu0 %vm825_vm1, %v1854_v36 }
 0xb7b   : > { %2095 = vmatpush1.bf16.msra.mxu0 %v3654_v35  ;;  %2126 = vmatprep.mubr.bf16.mxu0 %v3802_v13  ;;  %v3662_v13 = vld [vmem:[%s4600_s18 + $0x10] sm:$0xff]  }
 0xb7c   : > { %2096 = vmatprep.subr.bf16.mxu0 %v3659_v38  ;;  %3444 = vmatpush3.bf16.msra.mxu1 %v3662_v13  ;;  %v3183_v13 = vld [vmem:[%s4595_s13 + $0x1] ss:$0 sm:$0xff] }
 0xb7d   : > { %3445 = vmatprep.subr.bf16.mxu1 %v3800_v46 }
 0xb7f   : > { %2097 = vmatpush1.bf16.msra.mxu0 %v3657_v39 }
 0xb80   : > { %3459 = vmatprep.subr.bf16.mxu0 %v3800_v46 }
 0xb82   : > { %3177 = vmatmul.mubr.msk.bf16.vlgmr.msra.gmra.mrb[36].mxu0 %vm825_vm1, %v4121_v26  ;;  %v3663_v26 = vld [vmem:[%s4600_s18 + $0x18] sm:$0xff]  }
 0xb83   : > { %3463 = vmatprep.mubr.msk.bf16.mxu0 %vm3801_vm0, %v3800_v46  ;;  %3446 = vmatpush3.bf16.msra.mxu1 %v3663_v26 }
 0xb84   : > { %3447 = vmatprep.subr.bf16.mxu1 %v3800_v46  ;;  %3460 = vmatpush3.bf16.msra.mxu0 %v3668_v25 }
 0xb85   : > { %3461 = vmatprep.subr.bf16.mxu0 %v3800_v46 }
 0xb87   : > { %3448 = vmatpush3.bf16.msra.mxu1 %v3664_v41 }
 0xb88   : > { %3449 = vmatprep.subr.bf16.mxu1 %v3800_v46  ;;  %3462 = vmatpush3.bf16.msra.mxu0 %v3669_v27 }
 0xb89   : > { %3467 = vmatprep.subr.bf16.mxu0 %v3800_v46 }
 0xb8b   : > { %3450 = vmatpush3.bf16.msra.mxu1 %v3665_v42 }
 0xb8c   : > { %3451 = vmatprep.subr.bf16.mxu1 %v3800_v46 }
 0xb8f   : > { %3452 = vmatpush3.bf16.msra.mxu1 %v3666_v43 }
 0xb90   : > { %3453 = vmatprep.subr.bf16.mxu1 %v3800_v46 }
 0xb93   : > { %3454 = vmatpush3.bf16.msra.mxu1 %v3667_v44 }
 0xb94   : > { %3479 = vmatprep.subr.bf16.mxu1 %v3800_v46 }
 0xc4d   : > { %v1915_v47 = vpop.f32.mrb[32].mxu0 }
 0xc4e   : > { %v1916_v48 = vadd.f32 %v3155_v45, %v1915_v47  ;;  %v3437_v49 = vpop.f32.mrb[33].mxu0 }
 0xc4f   : > { %v1918_v50 = vpop.f32.mrb[34].mxu0 }
 0xc50   : > { %v1922_v52 = vmul.f32 0.044715, %v1916_v48  ;;  %v3438_v53 = vpop.f32.mrb[35].mxu0  ;;  %v1921_v3 = vmul.f32 0.5, %v1916_v48 }
 0xc52   : > { %v1923_v55 = vmul.f32 %v1922_v52, %v1916_v48 }
 0xc54   : > { %v1924_v57 = vmul.f32 %v1923_v55, %v1916_v48 }
 0xc55   : > { %v2128_v58 = vpop.f32.mrb[36].mxu0 }
 0xc56   : > { %v1925_v59 = vadd.f32 %v1924_v57, %v1916_v48  ;;  %v2130_v60 = vpop.f32.mrb[37].mxu0  ;;  %v2129_v21 = vadd.f32 %v2128_v58, %v2087_v37 }
 0xc57   : > { %v4338_v61 = vadd.f32 %v2130_v60, %v2091_v56  ;;  %v2132_v62 = vpop.f32.mrb[38].mxu0 }
 0xc58   : > { %v2133_v63 = vpop.f32.mrb[39].mxu0  ;;  %v1926_v1 = vmul.f32 0.7978846, %v1925_v59  ;;  %v2148_v9 = vadd.f32 1.0, %v2129_v21  ;;  %v4368_v36 = vrot.slane %v2129_v21, %v4061_v31 }
 0xc5a   : > { %3712 = vtanh.f32 %v1926_v1  ;;  %v2152_v0 = vrot.slane %v2148_v9, %v4061_v31 }
 0xc64   : > { %v3713_v2 = vpop.eup %3712 }
 0xc65   : > { %v1928_v4 = vadd.f32 1.0, %v3713_v2 }
 0xc67   : > { %v1929_v5 = vmul.f32 %v1928_v4, %v1921_v3 }
 0xc69   : > { %v1930_v6 = vpack.c.bf16 %v1929_v5, %v1929_v5 }
 0xc6b   : > { %3456 = vmatmul.mubr.bf16.vlgmr.msra.gmra.mrb[24].mxu1 %v1930_v6 }
 0xc6c   : > { %3481 = vmatprep.mubr.msk.bf16.mxu1 %vm3801_vm0, %v3800_v46 }
 0xd3e   : > { %v2036_v7 = vpop.f32.mrb[24].mxu1 }
 0xd3f   : > { %v2037_v8 = vadd.f32 %v3159_v33, %v2036_v7  ;;  %v3457_v10 = vpop.f32.mrb[25].mxu1 }
 0xd40   : > { %v2039_v11 = vpop.f32.mrb[26].mxu1 }
 0xd41   : > { %2047 = vrot.lane.b32.xlu1 %v2037_v8, %s3817_s24  ;;  %v3458_v12 = vpop.f32.mrb[27].mxu1 }
 0xdb3   : > { %v2048_v16 = vpop.permute.xlu1 %2047 }
 0xdb4   : > { %v2050_v17 = vmul.f32 %v2048_v16, %v2045_v15 }
 0xdb6   : > { %2052 = vrot.lane.b32.xlu1 %v2050_v17, %s3803_s3 }
 0xe28   : > { %v2053_v18 = vpop.permute.xlu1 %2052 }
 0xe29   : > { %v4350_v19 = vadd.f32 %v2053_v18, %v4263_v14 }
 0xe2b   : > { %v2135_v20 = vsel %vm825_vm1, %v4350_v19, 0.0 }
 0xe2c   : > { %2136 = vadd.xlane.f32.xlu0 %v2135_v20 }
 0xe42   : > { %2154 = vrot.lane.b32.xlu0 %v2152_v0, %s3803_s3 }
 0xeb9   : > { %v2137_v51 = vpop.xlane.xlu0 %2136 }
 0xeba   : > { %v2138_v22 = vmul.f32 0.03125, %v2137_v51 }
 0xebc   : > { %v2139_v23 = vsub.f32 %v4350_v19, %v2138_v22 }
 0xebd   : > { %v2155_v35 = vpop.permute.xlu0 %2154 }
 0xebe   : > { %v2140_v24 = vmul.f32 %v2139_v23, %v2139_v23 }
 0xec0   : > { %v2141_v14 = vsel %vm825_vm1, %v2140_v24, 0.0 }
 0xec1   : > { %2142 = vadd.xlane.f32.xlu1 %v2141_v14 }
 0xf4e   : > { %v2143_v28 = vpop.xlane.xlu1 %2142 }
 0xf4f   : > { %v2144_v29 = vmul.f32 0.03125, %v2143_v28 }
 0xf51   : > { %v2145_v30 = vadd.f32 1e-06, %v2144_v29 }
 0xf53   : > { %3714 = vrsqrt.f32 %v2145_v30 }
 0xf5d   : > { %v3715_v32 = vpop.eup %3714 }
 0xf5e   : > { %v2147_v34 = vmul.f32 %v3715_v32, %v2139_v23 }
 0xf60   : > { %v2157_v38 = vmul.f32 %v2155_v35, %v2147_v34 }
 0xf62   : > { %v2162_v39 = vadd.f32 %v4368_v36, %v2157_v38 }
 0xf64   : > { %v2163_v40 = vpack.c.bf16 %v2162_v39, %v2162_v39 }
 0xf66   : > { %3464 = vmatmul.mubr.msk.bf16.vlgmr.msra.gmra.mrb[40].mxu0 %vm825_vm1, %v2163_v40 }
 0xf67   : > { %3469 = vmatprep.mubr.msk.bf16.mxu0 %vm3801_vm0, %v3800_v46 }
0x1039   : > { %v2226_v26 = vpop.f32.mrb[40].mxu0 }
0x103a   : > { %v2227_v41 = vadd.f32 %v3183_v13, %v2226_v26  ;;  %v3465_v42 = vpop.f32.mrb[41].mxu0 }
0x103b   : > { %v2229_v43 = vpop.f32.mrb[42].mxu0 }
0x103c   : > { %v4377_v44 = vpack.c.bf16 %v2227_v41, %v2227_v41  ;;  %v3466_v45 = vpop.f32.mrb[43].mxu0 }
0x103e   : > { %2345 = vrot.lane.b32.xlu0 %v4377_v44, %s3806_s22  ;;  %2234 = vrot.lane.b32.xlu1 %v4377_v44, %s3803_s3  ;;  %s4650_s22 = smov 64  }
0x1042   : > { %2456 = vrot.lane.b32.xlu0 %v4377_v44, %s3804_s19  ;;  %2343 = vrot.lane.b32.xlu1 %v4377_v44, %s3807_s2  ;;  %s4648_s19 = smov 56   ;;  %s4651_s2 = smov 40  }
0x1046   : > { %2567 = vrot.lane.b32.xlu0 %v4377_v44, %s3805_s20  ;;  %2454 = vrot.lane.b32.xlu1 %v4377_v44, %s3808_s4  ;;  %s4649_s20 = smov 48  }
0x104a   : > { %2565 = vrot.lane.b32.xlu1 %v4377_v44, %s3809_s25 }
0x10b0   : > { %v2346_v47 = vpop.permute.xlu0 %2345  ;;  %v2235_v48 = vpop.permute.xlu1 %2234 }
0x10b1   : > { %v2351_v49 = vsel %vm1294_vm2, %v2346_v47, 0  ;;  %v2240_v50 = vsel %vm1294_vm2, %v2235_v48, 0 }
0x10b2   : > { %3468 = vmatpush3.bf16.xpose.msra.mxu0 %v2240_v50  ;;  %3480 = vmatpush3.bf16.xpose.msra.mxu1 %v2351_v49 }
0x10b3   : > { %3491 = vmatprep.subr.bf16.mxu1 %v3800_v46  ;;  %3473 = vmatprep.subr.bf16.mxu0 %v3800_v46 }
0x10b4   : > { %v2457_v52 = vpop.permute.xlu0 %2456  ;;  %v2344_v53 = vpop.permute.xlu1 %2343 }
0x10b5   : > { %v2462_v54 = vsel %vm1294_vm2, %v2457_v52, 0 }
0x10b8   : > { %v2568_v55 = vpop.permute.xlu0 %2567  ;;  %v2455_v56 = vpop.permute.xlu1 %2454 }
0x10b9   : > { %3470 = vmatmul.mubr.msk.bf16.vlgmr.msra.gmra.mrb[44].mxu0 %vm1294_vm2, %v4377_v44  ;;  %3482 = vmatmul.mubr.msk.bf16.vlgmr.msra.gmra.mrb[28].mxu1 %vm1294_vm2, %v2344_v53  ;;  %v2573_v57 = vsel %vm1294_vm2, %v2568_v55, 0 }
0x10ba   : > { %3492 = vmatpush3.bf16.xpose.msra.mxu1 %v2462_v54  ;;  %3493 = vmatprep.mubr.msk.bf16.mxu1 %vm3801_vm0, %v3800_v46 }
0x10bb   : > { %3503 = vmatprep.subr.bf16.mxu1 %v3800_v46  ;;  %3475 = vmatprep.mubr.msk.bf16.mxu0 %vm3801_vm0, %v3800_v46 }
0x10bc   : > { %v2566_v58 = vpop.permute.xlu1 %2565 }
0x10c1   : > { %3494 = vmatmul.mubr.msk.bf16.vlgmr.msra.gmra.mrb[32].mxu1 %vm1294_vm2, %v2455_v56 }
0x10c2   : > { %3504 = vmatpush3.bf16.xpose.msra.mxu1 %v2573_v57  ;;  %3505 = vmatprep.mubr.msk.bf16.mxu1 %vm3801_vm0, %v3800_v46 }
0x10c3   : > { %3515 = vmatprep.subr.bf16.mxu1 %v3800_v46 }
0x10c9   : > { %3506 = vmatmul.mubr.msk.bf16.vlgmr.msra.gmra.mrb[36].mxu1 %vm1294_vm2, %v2566_v58 }
0x10ca   : > { %3519 = vmatprep.mubr.msk.bf16.mxu1 %vm3801_vm0, %v3800_v46 }
0x118c   : > { %v2276_v59 = vpop.f32.mrb[44].mxu0  ;;  %v2387_v60 = vpop.f32.mrb[28].mxu1 }
0x118d   : > { %v2282_v62 = vmul.f32 0.35355338, %v2276_v59  ;;  %v2393_v63 = vmul.f32 0.35355338, %v2387_v60  ;;  %v3471_v1 = vpop.f32.mrb[45].mxu0  ;;  %v3483_v2 = vpop.f32.mrb[29].mxu1 }
0x118e   : > { %v2279_v3 = vpop.f32.mrb[46].mxu0  ;;  %v2390_v4 = vpop.f32.mrb[30].mxu1 }
0x118f   : > { %v3472_v5 = vpop.f32.mrb[47].mxu0  ;;  %v3484_v6 = vpop.f32.mrb[31].mxu1  ;;  %v2394_v33 = vsel %vm1294_vm2, %v2393_v63, -inf  ;;  %v2283_v7 = vsel %vm1294_vm2, %v2282_v62, -inf }
0x1190   : > { %2395 = vmax.xlane.f32.xlu1 %v2394_v33  ;;  %2284 = vmax.xlane.f32.xlu0 %v2283_v7 }
0x1194   : > { %v2498_v8 = vpop.f32.mrb[32].mxu1 }
0x1195   : > { %v2504_v10 = vmul.f32 0.35355338, %v2498_v8  ;;  %v3495_v11 = vpop.f32.mrb[33].mxu1 }
0x1196   : > { %v2501_v12 = vpop.f32.mrb[34].mxu1 }
0x1197   : > { %v3496_v15 = vpop.f32.mrb[35].mxu1  ;;  %v2505_v16 = vsel %vm1294_vm2, %v2504_v10, -inf }
0x1198   : > { %2506 = vmax.xlane.f32.xlu0 %v2505_v16 }
0x119c   : > { %v2609_v17 = vpop.f32.mrb[36].mxu1 }
0x119d   : > { %v2615_v18 = vmul.f32 0.35355338, %v2609_v17  ;;  %v3507_v20 = vpop.f32.mrb[37].mxu1 }
0x119e   : > { %v2612_v37 = vpop.f32.mrb[38].mxu1 }
0x119f   : > { %v3508_v21 = vpop.f32.mrb[39].mxu1  ;;  %v2616_v9 = vsel %vm1294_vm2, %v2615_v18, -inf }
0x11a0   : > { %2617 = vmax.xlane.f32.xlu0 %v2616_v9  ;;  %v3671_v21 = vld [vmem:[%s4596_s14 + $0x18] sm:$0xff]  }
0x121d   : > { %v2396_v0 = vpop.xlane.xlu1 %2395  ;;  %v2285_v51 = vpop.xlane.xlu0 %2284 }
0x121e   : > { %v2397_v22 = vsub.f32 %v2393_v63, %v2396_v0  ;;  %v2286_v23 = vsub.f32 %v2282_v62, %v2285_v51 }
0x1220   : > { %v2398_v24 = vmul.f32 1.442695, %v2397_v22  ;;  %v2287_v14 = vmul.f32 1.442695, %v2286_v23 }
0x1222   : > { %3716 = vpow2.f32 %v2398_v24 }
0x1223   : > { %3718 = vpow2.f32 %v2287_v14 }
0x1225   : > { %v2507_v25 = vpop.xlane.xlu0 %2506 }
0x1226   : > { %v2508_v27 = vsub.f32 %v2504_v10, %v2507_v25  ;;  %v3670_v10 = vld [vmem:[%s4596_s14 + $0x10] sm:$0xff]  }
0x1227   : > { %3516 = vmatpush3.bf16.msra.mxu1 %v3670_v10 }
0x1228   : > { %v2509_v28 = vmul.f32 1.442695, %v2508_v27  ;;  %3517 = vmatprep.subr.bf16.mxu1 %v3800_v46 }
0x122a   : > { %3720 = vpow2.f32 %v2509_v28 }
0x122b   : > { %3518 = vmatpush3.bf16.msra.mxu1 %v3671_v21 }
0x122c   : > { %v3717_v29 = vpop.eup %3716  ;;  %3531 = vmatprep.subr.bf16.mxu1 %v3800_v46 }
0x122d   : > { %v3719_v30 = vpop.eup %3718  ;;  %v2400_v32 = vsel %vm1294_vm2, %v3717_v29, 0.0  ;;  %v2618_v39 = vpop.xlane.xlu0 %2617 }
0x122e   : > { %2401 = vadd.xlane.f32.xlu1 %v2400_v32  ;;  %v2289_v34 = vsel %vm1294_vm2, %v3719_v30, 0.0  ;;  %v2619_v40 = vsub.f32 %v2615_v18, %v2618_v39 }
0x122f   : > { %2290 = vadd.xlane.f32.xlu0 %v2289_v34 }
0x1230   : > { %v2620_v13 = vmul.f32 1.442695, %v2619_v40 }
0x1232   : > { %3722 = vpow2.f32 %v2620_v13 }
0x1234   : > { %v3721_v35 = vpop.eup %3720 }
0x1235   : > { %v2511_v38 = vsel %vm1294_vm2, %v3721_v35, 0.0 }
0x1236   : > { %2512 = vadd.xlane.f32.xlu0 %v2511_v38 }
0x123c   : > { %v3723_v26 = vpop.eup %3722 }
0x123d   : > { %v2622_v41 = vsel %vm1294_vm2, %v3723_v26, 0.0 }
0x123f   : > { %2406 = vrot.lane.b32.xlu1 %v4377_v44, %s4648_s19 }
0x1243   : > { %2517 = vrot.lane.b32.xlu1 %v4377_v44, %s4649_s20  ;;  %s633_s20 = sand.u32 1, %s4655_s30  }
0x124c   : > { %2295 = vrot.lane.b32.xlu0 %v4377_v44, %s4650_s22 }
0x1267   : > { %2623 = vadd.xlane.f32.xlu1 %v2622_v41 }
0x1278   : > { %2628 = vrot.lane.b32.xlu1 %v4377_v44, %s4651_s2 }
0x12bb   : > { %v2402_v43 = vpop.xlane.xlu1 %2401 }
0x12bc   : > { %v2291_v42 = vpop.xlane.xlu0 %2290 }
0x12bd   : > { %3724 = vrcp.f32 %v2291_v42 }
0x12be   : > { %3726 = vrcp.f32 %v2402_v43 }
0x12bf   : > { %v2407_v52 = vpop.permute.xlu1 %2406 }
0x12c0   : > { %v2412_v55 = vsel %vm1359_vm3, %v2407_v52, 0  ;;  %v3674_v52 = vld [vmem:[%s4600_s18 + $0x40] sm:$0xff]  }
0x12c3   : > { %v2513_v45 = vpop.xlane.xlu0 %2512  ;;  %v2518_v56 = vpop.permute.xlu1 %2517 }
0x12c4   : > { %3728 = vrcp.f32 %v2513_v45  ;;  %v2523_v59 = vsel %vm1359_vm3, %v2518_v56, 0 }
0x12c7   : > { %v3725_v47 = vpop.eup %3724  ;;  %v2296_v48 = vpop.permute.xlu0 %2295 }
0x12c8   : > { %v2293_v49 = vmul.f32 %v3725_v47, %v3719_v30  ;;  %v2301_v50 = vsel %vm1359_vm3, %v2296_v48, 0  ;;  %v3727_v54 = vpop.eup %3726  ;;  %v3200_v30 = vld [vmem:[%s4597_s15 + $0x1] ss:$0 sm:$0xff] }
0x12c9   : > { %3474 = vmatpush3.bf16.msra.mxu0 %v2301_v50  ;;  %v2404_v44 = vmul.f32 %v3727_v54, %v3717_v29  ;;  %v3673_v50 = vld [vmem:[%s4598_s16 + $0x18] sm:$0xff]  }
0x12ca   : > { %v2294_v53 = vpack.c.bf16 %v2293_v49, %v2293_v49  ;;  %3485 = vmatprep.subr.bf16.mxu0 %v3800_v46 }
0x12cb   : > { %v2405_v57 = vpack.c.bf16 %v2404_v44, %v2404_v44 }
0x12cc   : > { %3476 = vmatmul.mubr.msk.bf16.vlgmr.msra.gmra.mrb[48].mxu0 %vm1294_vm2, %v2294_v53 }
0x12cd   : > { %3486 = vmatpush3.bf16.msra.mxu0 %v2412_v55  ;;  %3487 = vmatprep.mubr.msk.bf16.mxu0 %vm3801_vm0, %v3800_v46  ;;  %v2783_v55 = vadd.f32 1.0, %v4338_v61 }
0x12ce   : > { %3497 = vmatprep.subr.bf16.mxu0 %v3800_v46  ;;  %v3729_v58 = vpop.eup %3728 }
0x12cf   : > { %v2515_v60 = vmul.f32 %v3729_v58, %v3721_v35 }
0x12d1   : > { %v2516_v62 = vpack.c.bf16 %v2515_v60, %v2515_v60 }
0x12d4   : > { %3488 = vmatmul.mubr.msk.bf16.vlgmr.msra.gmra.mrb[52].mxu0 %vm1294_vm2, %v2405_v57  ;;  %v2787_v57 = vrot.slane %v2783_v55, %v4061_v31 }
0x12d5   : > { %3498 = vmatpush3.bf16.msra.mxu0 %v2523_v59  ;;  %3499 = vmatprep.mubr.msk.bf16.mxu0 %vm3801_vm0, %v3800_v46 }
0x12d6   : > { %3509 = vmatprep.subr.bf16.mxu0 %v3800_v46 }
0x12dc   : > { %3500 = vmatmul.mubr.msk.bf16.vlgmr.msra.gmra.mrb[56].mxu0 %vm1294_vm2, %v2516_v62 }
0x12dd   : > { %3511 = vmatprep.mubr.msk.bf16.mxu0 %vm3801_vm0, %v3800_v46 }
0x12f4   : > { %v2624_v63 = vpop.xlane.xlu1 %2623 }
0x12f5   : > { %3730 = vrcp.f32 %v2624_v63  ;;  %v3675_v63 = vld [vmem:[%s4600_s18 + $0x48] sm:$0xff]  }
0x12f8   : > { %v2629_v1 = vpop.permute.xlu1 %2628 }
0x12f9   : > { %v2634_v2 = vsel %vm1359_vm3, %v2629_v1, 0  ;;  %v3676_v1 = vld [vmem:[%s4600_s18 + $0x50] sm:$0xff]  }
0x12fa   : > { %3510 = vmatpush3.bf16.msra.mxu0 %v2634_v2  ;;  %v3677_v2 = vld [vmem:[%s4600_s18 + $0x58] sm:$0xff]  }
0x12fb   : > { %3523 = vmatprep.subr.bf16.mxu0 %v3800_v46 }
0x12ff   : > { %v3731_v3 = vpop.eup %3730 }
0x1300   : > { %v2626_v4 = vmul.f32 %v3731_v3, %v3723_v26  ;;  %v3678_v3 = vld [vmem:[%s4600_s18 + $0x60] sm:$0xff]  }
0x1302   : > { %v2627_v5 = vpack.c.bf16 %v2626_v4, %v2626_v4  ;;  %v3679_v4 = vld [vmem:[%s4600_s18 + $0x68] sm:$0xff]  }
0x1304   : > { %3512 = vmatmul.mubr.msk.bf16.vlgmr.msra.gmra.mrb[60].mxu0 %vm1294_vm2, %v2627_v5  ;;  %v3680_v5 = vld [vmem:[%s4600_s18 + $0x70] sm:$0xff]  }
0x1305   : > { %3527 = vmatprep.mubr.msk.bf16.mxu0 %vm3801_vm0, %v3800_v46 }
0x139f   : > { %v2337_v6 = vpop.f32.mrb[48].mxu0 }
0x13a0   : > { %v3477_v33 = vpop.f32.mrb[49].mxu0 }
0x13a1   : > { %v2340_v7 = vpop.f32.mrb[50].mxu0  ;;  %v3209_v33 = vld [vmem:[%s4599_s17 + $0x1] ss:$0 sm:$0xff] }
0x13a2   : > { %v3478_v8 = vpop.f32.mrb[51].mxu0 }
0x13a7   : > { %v2448_v11 = vpop.f32.mrb[52].mxu0 }
0x13a8   : > { %2677 = vrot.lane.b32.xlu0 %v2448_v11, %s4652_s26  ;;  %v3489_v12 = vpop.f32.mrb[53].mxu0 }
0x13a9   : > { %v2451_v15 = vpop.f32.mrb[54].mxu0 }
0x13aa   : > { %v3490_v16 = vpop.f32.mrb[55].mxu0 }
0x13af   : > { %v2559_v17 = vpop.f32.mrb[56].mxu0 }
0x13b0   : > { %2681 = vrot.lane.b32.xlu1 %v2559_v17, %s4653_s27  ;;  %v3501_v18 = vpop.f32.mrb[57].mxu0 }
0x13b1   : > { %v2562_v20 = vpop.f32.mrb[58].mxu0 }
0x13b2   : > { %v3502_v37 = vpop.f32.mrb[59].mxu0 }
0x13d7   : > { %v2670_v9 = vpop.f32.mrb[60].mxu0 }
0x13d8   : > { %2685 = vrot.lane.b32.xlu0 %v2670_v9, %s4654_s1  ;;  %v3513_v0 = vpop.f32.mrb[61].mxu0  ;;  %s4656_s1 = sld [smem:[#allocation9_spill]] }
0x13d9   : > { %v2673_v51 = vpop.f32.mrb[62].mxu0 }
0x13da   : > { %v3514_v22 = vpop.f32.mrb[63].mxu0  ;;  %v3230_v51 = vld [vmem:[%s4647_s0 + $0x1] ss:$0 sm:$0xff] }
0x13de   : > { %s3240_s2 = sshll.u32 %s4656_s1, 7  ;;  %s3818_s1 = smov [#allocation2]  }
0x13df   : > { %s3740_s28 = sshll.u32 %s3818_s1, 4  ;;  %s3741_s28 = int_to_ptr.vmem [resolvable:$false] %s3740_s28 }
0x141a   : > { %v2678_v23 = vpop.permute.xlu0 %2677 }
0x141b   : > { %v2688_v14 = vsel %vm1294_vm2, %v2337_v6, %v2678_v23  ;;  %v3681_v6 = vld [vmem:[%s4600_s18 + $0x78] sm:$0xff]  }
0x1422   : > { %v2682_v24 = vpop.permute.xlu1 %2681 }
0x1423   : > { %v2689_v25 = vsel %vm1749_vm4, %v2688_v14, %v2682_v24 }
0x144a   : > { %v2686_v27 = vpop.permute.xlu0 %2685 }
0x144b   : > { %v2690_v28 = vsel %vm1751_vm5, %v2689_v25, %v2686_v27  ;;  %v2989_v27 = vrot.slane %v4338_v61, %v4061_v31 }
0x144c   : > { %v2691_v29 = vpack.c.bf16 %v2690_v28, %v2690_v28 }
0x144e   : > { %3520 = vmatmul.mubr.msk.bf16.vlgmr.msra.gmra.mrb[40].mxu1 %vm825_vm1, %v2691_v29 }
0x144f   : > { %3547 = vmatprep.mubr.msk.bf16.mxu1 %vm3801_vm0, %v3800_v46  ;;  %3532 = vmatpush3.bf16.msra.mxu1 %v3674_v52 }
0x1450   : > { %3533 = vmatprep.subr.bf16.mxu1 %v3800_v46 }
0x1453   : > { %3534 = vmatpush3.bf16.msra.mxu1 %v3675_v63 }
0x1454   : > { %3535 = vmatprep.subr.bf16.mxu1 %v3800_v46 }
0x1457   : > { %3536 = vmatpush3.bf16.msra.mxu1 %v3676_v1 }
0x1458   : > { %3537 = vmatprep.subr.bf16.mxu1 %v3800_v46 }
0x145b   : > { %3538 = vmatpush3.bf16.msra.mxu1 %v3677_v2 }
0x145c   : > { %3539 = vmatprep.subr.bf16.mxu1 %v3800_v46 }
0x145f   : > { %3540 = vmatpush3.bf16.msra.mxu1 %v3678_v3 }
0x1460   : > { %3541 = vmatprep.subr.bf16.mxu1 %v3800_v46 }
0x1463   : > { %3542 = vmatpush3.bf16.msra.mxu1 %v3679_v4 }
0x1464   : > { %3543 = vmatprep.subr.bf16.mxu1 %v3800_v46 }
0x1467   : > { %3544 = vmatpush3.bf16.msra.mxu1 %v3680_v5 }
0x1468   : > { %3545 = vmatprep.subr.bf16.mxu1 %v3800_v46 }
0x146b   : > { %3546 = vmatpush3.bf16.msra.mxu1 %v3681_v6 }
0x1521   : > { %v2754_v32 = vpop.f32.mrb[40].mxu1 }
0x1522   : > { %v2755_v34 = vadd.f32 %v3200_v30, %v2754_v32  ;;  %v3521_v35 = vpop.f32.mrb[41].mxu1 }
0x1523   : > { %v2757_v38 = vpop.f32.mrb[42].mxu1 }
0x1524   : > { %2761 = vrot.lane.b32.xlu1 %v2755_v34, %s4650_s22  ;;  %v3522_v39 = vpop.f32.mrb[43].mxu1 }
0x1596   : > { %v2762_v40 = vpop.permute.xlu1 %2761 }
0x1597   : > { %v2764_v13 = vmul.f32 %v2762_v40, %v4368_v36 }
0x1599   : > { %2766 = vrot.lane.b32.xlu0 %v2764_v13, %s4650_s22  ;;  %s3090_s22 = sshll.u32 %s633_s20, 3 }
0x159a   : > { %s635_s4 = scalar_lea.vmem [#allocation2], %s3090_s22  ;;  %s3742_s22 = scalar_lea.vmem %s3741_s28, 256 }
0x159b   : > { %s3015_s25 = sshll.u32 %s635_s4, 4  ;;  %s4541_s25 = int_to_ptr.vmem [resolvable:$true] %s3015_s25 }
0x159c   : > { %s3736_s30 = scalar_lea.vmem %s4541_s25, 128  ;;  %p3743_p0 = scmp.lt.s32.totalorder %s4541_s25, %s3741_s28 }
0x159d   : > { %p3737_p11 = scmp.ne.s32.totalorder %s4541_s25, %s3736_s30  ;;  %p3744_p1 = scmp.lt.s32.totalorder %s3742_s22, %s3736_s30 }
0x159f   : > { %p3738_p12 = pnand %p3737_p11, %p3962_p5  ;;  %p3745_p2 = por %p3744_p1, %p3743_p0 }
0x15a1   : > { %p3739_p13 = pneg %p3738_p12 }
0x15a3   : > { %p3746_p3 = pnand %p3745_p2, %p3739_p13 }
0x160b   : > { %v2767_v26 = vpop.permute.xlu0 %2766 }
0x160c   : > { %v4474_v41 = vadd.f32 %v2767_v26, %v4350_v19  ;;  %v3672_v19 = vld [vmem:[%s4598_s16 + $0x10] sm:$0xff]  }
0x160d   : > { %3524 = vmatpush3.bf16.msra.mxu0 %v3672_v19 }
0x160e   : > { %v2770_v42 = vsel %vm825_vm1, %v4474_v41, 0.0  ;;  %3525 = vmatprep.subr.bf16.mxu0 %v3800_v46 }
0x160f   : > { %2771 = vadd.xlane.f32.xlu1 %v2770_v42 }
0x1611   : > { %3526 = vmatpush3.bf16.msra.mxu0 %v3673_v50 }
0x169c   : > { %v2772_v43 = vpop.xlane.xlu1 %2771 }
0x169d   : > { %v2773_v45 = vmul.f32 0.03125, %v2772_v43 }
0x169f   : > { %v2774_v47 = vsub.f32 %v4474_v41, %v2773_v45 }
0x16a1   : > { %v2775_v48 = vmul.f32 %v2774_v47, %v2774_v47 }
0x16a3   : > { %v2776_v49 = vsel %vm825_vm1, %v2775_v48, 0.0 }
0x16a4   : > { %2777 = vadd.xlane.f32.xlu0 %v2776_v49 }
0x16ba   : > { %2790 = vrot.lane.b32.xlu0 %v4368_v36, %s3817_s24 }
0x1731   : > { %v2778_v36 = vpop.xlane.xlu0 %2777 }
0x1732   : > { %v2779_v53 = vmul.f32 0.03125, %v2778_v36 }
0x1734   : > { %v2780_v54 = vadd.f32 1e-06, %v2779_v53 }
0x1735   : > { %v2791_v59 = vpop.permute.xlu0 %2790 }
0x1736   : > { %3732 = vrsqrt.f32 %v2780_v54 }
0x1740   : > { %v3733_v44 = vpop.eup %3732 }
0x1741   : > { %v2782_v56 = vmul.f32 %v3733_v44, %v2774_v47 }
0x1743   : > { %v2788_v58 = vmul.f32 %v2787_v57, %v2782_v56 }
0x1745   : > { %v2793_v60 = vadd.f32 %v2791_v59, %v2788_v58 }
0x1747   : > { %v2794_v62 = vpack.c.bf16 %v2793_v60, %v2793_v60 }
0x1749   : > { %3528 = vmatmul.mubr.msk.bf16.vlgmr.msra.gmra.mrb[64].mxu0 %vm825_vm1, %v2794_v62 }
0x181c   : > { %v2857_v7 = vpop.f32.mrb[64].mxu0 }
0x181d   : > { %v2858_v8 = vadd.f32 %v3209_v33, %v2857_v7  ;;  %v3529_v10 = vpop.f32.mrb[65].mxu0 }
0x181e   : > { %v2860_v11 = vpop.f32.mrb[66].mxu0 }
0x181f   : > { %v2864_v12 = vmul.f32 0.044715, %v2858_v8  ;;  %v3530_v15 = vpop.f32.mrb[67].mxu0  ;;  %v2863_v21 = vmul.f32 0.5, %v2858_v8 }
0x1821   : > { %v2865_v16 = vmul.f32 %v2864_v12, %v2858_v8 }
0x1823   : > { %v2866_v17 = vmul.f32 %v2865_v16, %v2858_v8 }
0x1825   : > { %v2867_v18 = vadd.f32 %v2866_v17, %v2858_v8 }
0x1827   : > { %v2868_v20 = vmul.f32 0.7978846, %v2867_v18 }
0x1829   : > { %3734 = vtanh.f32 %v2868_v20 }
0x1833   : > { %v3735_v37 = vpop.eup %3734 }
0x1834   : > { %v2870_v46 = vadd.f32 1.0, %v3735_v37 }
0x1836   : > { %v2871_v9 = vmul.f32 %v2870_v46, %v2863_v21 }
0x1838   : > { %v2872_v0 = vpack.c.bf16 %v2871_v9, %v2871_v9 }
0x183a   : > { %3548 = vmatmul.mubr.bf16.vlgmr.msra.gmra.mrb[44].mxu1 %v2872_v0 }
0x190d   : > { %v2980_v22 = vpop.f32.mrb[44].mxu1 }
0x190e   : > { %v2981_v23 = vadd.f32 %v3230_v51, %v2980_v22  ;;  %v3549_v24 = vpop.f32.mrb[45].mxu1 }
0x190f   : > { %v2983_v14 = vpop.f32.mrb[46].mxu1 }
0x1910   : > { %2991 = vrot.lane.b32.xlu1 %v2981_v23, %s3817_s24  ;;  %v3550_v25 = vpop.f32.mrb[47].mxu1  ;;  %s4658_s24 = sld [smem:[#allocation20_spill]] }
0x1916   : > { %s4659_s29 = smov %s4658_s24  ;;  %s4539_s23 = scalar_lea.hbm %s4658_s24, %s3240_s2 }
0x1982   : > { %v2992_v28 = vpop.permute.xlu1 %2991 }
0x1983   : > { %v2994_v29 = vmul.f32 %v2992_v28, %v2989_v27 }
0x1985   : > { %2996 = vrot.lane.b32.xlu1 %v2994_v29, %s3803_s3  ;;  %s3002_s3 = scalar_lea.sflag [#allocation3], %s633_s20 }
0x19f7   : > { %v2997_v30 = vpop.permute.xlu1 %2996 }
0x19f8   : > { %v2999_v32 = vadd.f32 %v2997_v30, %v4474_v41 }
0x19fa   : > { %3000 = vst.msk [vmem:[%s635_s4] sm:$0xff] %vm825_vm1, %v2999_v32 }
0x19fb   : > { %3749 = shalt.err (!%p3746_p3)
}
0x19fc   : > { %s3750_s20 = scalar_lea.hbm %s4539_s23, 128  ;;  %s3754_s26 = scalar_lea.hbm %s4659_s29, 256 }
0x19fd   : > { %p3751_p4 = scmp.ne.s32.totalorder %s4539_s23, %s3750_s20  ;;  %p3755_p9 = scmp.lt.u32.totalorder %s4539_s23, %s4659_s29 }
0x19fe   : > { %p3756_p10 = scmp.lt.u32.totalorder %s3754_s26, %s3750_s20  ;;  %p3758_p12 = scmp.lt.u32.totalorder %s3750_s20, %s4539_s23 }
0x19ff   : > { %p3752_p7 = pnand %p3751_p4, %p3962_p5 }
0x1a00   : > { %p3757_p11 = por %p3756_p10, %p3755_p9 }
0x1a01   : > { %p3753_p8 = pneg %p3752_p7 }
0x1a02   : > { %p3759_p13 = por %p3758_p12, %p3757_p11 }
0x1a04   : > { %p3760_p0 = pnand %p3759_p13, %p3753_p8 }
0x1a06   : > { %3763 = shalt.err (!%p3760_p0)
}
0x1a07   : > { %3551 = dma.vmem_to_hbm [thread:$0]  (%p3962_p5), %s4541_s25, 128, %s4539_s23, %s3002_s3  }
0x1a08 PF: > { %s4660_s30 = sld [smem:[#allocation8_spill]]  ;;  %s4661_s1 = sld [smem:[#allocation5_spill]] }
0x1a0e   : > { %p3557_p1 = scmp.ge.s32.totalorder %s4660_s30, 2  ;;  %s3027_s22 = sand.u32 1, %s4661_s1  }
0x1a0f   : > { %s3028_s2 = scalar_lea.sflag [#allocation3], %s3027_s22 }
0x1a10   : > { %p3554_p2 = pnand %p3557_p1, %p3966_p6 }
0x1a12   : > { %3781 = dma.done.wait (!%p3554_p2), %s3028_s2, 128  }
0x1a13   : > { %3783 = vsyncadd (!%p3554_p2), %s3028_s2, 4294967168  ;;  %s4663_s24 = sld [smem:[#allocation10_spill]]  ;;  %s4664_s1 = sld [smem:[#allocation6_spill]] }
0x1a14   : > { %s4665_s22 = sld [smem:[#allocation7_spill]]  ;;  %s4666_s23 = sld [smem:[#allocation11_spill]] }
0x1a19   : > { %p30_p3 = scmp.ge.s32.totalorder %s4663_s24, 4  }
0x1a1b   :  { %32 = sbr.rel (!%p30_p3) target bundleno = 11 (0xb), region = 148 }
0x1a22   :  { %3033 = vsyncpa [#allocation3], 1 }
0x1a23   :  { %3035 = vsyncpa [#allocation3 + $0x1], 1 }

</bundles_post_ra>
